<compile_context>
chip_gen: v6e
topology: v6e:2x2x1
jax: 0.10.0
libtpu: 0.0.40
codegen_flags: <defaults>
</compile_context>

<pallas_src>
import functools

import jax
import jax.numpy as jnp
from jax import lax
from jax.experimental import pallas as pl
from jax.experimental.pallas import tpu as pltpu


def _round_up(x, m):
    return ((x + m - 1) // m) * m


def _tpu_hw_info():
    """Returns (tensorcores sharing the grid, physical VMEM bytes per core)."""
    num_cores, vmem_phys = 1, 64 * 1024 * 1024          # conservative default
    try:
        kind = (jax.devices()[0].device_kind or "").lower()
        if "v7" in kind or "7x" in kind:
            num_cores, vmem_phys = 2, 64 * 1024 * 1024
        elif "v5" in kind or "v6" in kind:
            num_cores, vmem_phys = 1, 128 * 1024 * 1024
    except Exception:
        pass
    try:
        cap = int(pltpu.get_tpu_info().vmem_capacity_bytes)
        if cap > 0:
            vmem_phys = cap
    except Exception:
        pass
    return num_cores, vmem_phys


def _antirect_mixed(y, valid_c):
    """_antirectifier2 on a row tile.

    y: (tm, Cp) f32 where lanes >= valid_c are exactly zero (zero-padded
    weight columns / bias).  Returns concat([relu(z), relu(-z)], -1).
    """
    mean = jnp.sum(y, axis=-1, keepdims=True) * (1.0 / valid_c)
    mask = lax.broadcasted_iota(jnp.int32, y.shape, 1) < valid_c
    s = jnp.where(mask, y - mean, 0.0)                    # zero padded lanes
    sumsq = jnp.sum(s * s, axis=-1, keepdims=True)
    # rsqrt(max(ss,1e-24)) == 1/max(sqrt(ss),1e-12): one EUP push + one vmul.
    z = s * lax.rsqrt(jnp.maximum(sumsq, 1e-24))
    return jnp.concatenate([jnp.maximum(z, 0.0), jnp.maximum(-z, 0.0)], axis=-1)


def _aistap_fc_kernel(x_ref, w1_ref, b1_ref, w2_ref, b2_ref,
                      w3_ref, b3_ref, w4_ref, b4_ref, o_ref,
                      *, fs, c1, c2):
    pad = fs // 2
    tm = x_ref.shape[0]
    x = x_ref[...]                                        # (tm, Fin) bf16/f32

    # conv1: fs per-tap matmuls on the raw rows (input streamed from HBM
    # exactly once).  The +-d range shift is a sublane roll of the f32
    # partial product; rolled / wrapped rows always land in per-image zero
    # padding (Hp >= H + pad and blocks cover whole images), so no masks.
    y = None
    for k in range(fs):
        r = jnp.dot(x, w1_ref[k], preferred_element_type=jnp.float32)
        d = k - pad
        if d != 0:
            r = pltpu.roll(r, shift=(-d) % tm, axis=0)
        y = r if y is None else y + r
    y = y + b1_ref[...]

    # TODO(synk): nn.Dropout treated as identity (inference mode).
    wdt = w2_ref.dtype
    h = _antirect_mixed(y, c1).astype(wdt)                # (tm, 2*C1p)
    y = jnp.dot(h, w2_ref[...], preferred_element_type=jnp.float32) + b2_ref[...]
    h = _antirect_mixed(y, c2).astype(wdt)                # (tm, 2*C2p)
    y = jnp.dot(h, w3_ref[...], preferred_element_type=jnp.float32) + b3_ref[...]
    h = _antirect_mixed(y, c2).astype(wdt)
    y = jnp.dot(h, w4_ref[...], preferred_element_type=jnp.float32) + b4_ref[...]
    o_ref[...] = y.astype(o_ref.dtype)                    # lane-dense (tm, C4p)


def init_params(key, input_shape, filter_size=3):
    """Deterministic synthetic parameters with the shapes of AISTAP_FC.__init__."""
    _, _, W, C = input_shape
    in_ch = 2 * C
    mult = W * in_ch // 12
    C1 = 12 * filter_size * mult
    C2 = 6 * mult
    C4 = 12 * mult
    ks = jax.random.split(key, 8)

    def w(k, shape, fan_in):
        return jax.random.normal(k, shape, jnp.float32) / jnp.sqrt(fan_in)

    return dict(
        w1=w(ks[0], (C1, in_ch, filter_size, W), in_ch * filter_size * W),
        b1=w(ks[1], (C1,), 10.0),
        w2=w(ks[2], (C2, C1, 1, 2), 2 * C1),
        b2=w(ks[3], (C2,), 10.0),
        w3=w(ks[4], (C2, C2, 1, 2), 2 * C2),
        b3=w(ks[5], (C2,), 10.0),
        w4=w(ks[6], (C4, C2, 1, 2), 2 * C2),
        b4=w(ks[7], (C4,), 10.0),
    )


def aistap_fc_forward(x_in, params, noise_var=0.0, filter_size=3,
                      norm_output=False, row_tile=512,
                      compute_dtype=jnp.bfloat16):
    # TODO(synk): gen_tapered_noise_torch is not defined in the reference
    # source; only the noise_var == 0 path is supported.
    assert noise_var == 0.0
    N, H, W, C = x_in.shape
    in_ch = 2 * C
    Fin = W * in_ch
    fs = filter_size
    pad = fs // 2
    C1 = params["w1"].shape[0]
    C2 = params["w2"].shape[0]
    C4 = params["w4"].shape[0]
    # The per-row antirectifier is only equivalent to the torch (dim=(1,3))
    # reduction because conv1's kernel spans the full doppler width (W_out==1).
    assert params["w1"].shape[3] == W, "conv1 kernel must span the full doppler width"
    C1p, C2p, C4p = (_round_up(c, 128) for c in (C1, C2, C4))

    # view_real: concat([Re, Im], -1) -> (N, H, W, 2C); flatten doppler into
    # the feature axis with f = w*2C + c (row-major, no transpose needed).
    xr = jnp.concatenate([jnp.real(x_in), jnp.imag(x_in)], axis=-1).astype(jnp.float32)
    x_flat = xr.reshape(N, H, Fin)
    # >= `pad` zero rows per image (they double as conv1's zero padding) and a
    # sublane-friendly multiple of 16.
    Hp = _round_up(H + pad, 16)
    x_img = jnp.pad(x_flat, ((0, 0), (0, Hp - H), (0, 0)))

    # ---- per-generation tiling & VMEM budget -------------------------------
    num_cores, vmem_phys = _tpu_hw_info()
    budget = max(int(0.75 * vmem_phys), 32 << 20)
    in_bytes = jnp.dtype(compute_dtype).itemsize
    weight_bytes = ((fs * Fin * C1p + 2 * C1p * C2p + 2 * C2p * C2p
                     + 2 * C2p * C4p) * in_bytes
                    + (C1p + 2 * C2p + C4p) * 4)

    def act_bytes(images_per_block):
        th_ = images_per_block * Hp
        io = 2 * th_ * (Fin * in_bytes + C4p * 4)          # double-buffered in/out
        tmp = th_ * (2 * C1p + 2 * C2p + C4p) * 4          # live intermediates
        return io + 2 * tmp                                # + spill headroom

    ipb = max(1, min(N, max(1, row_tile // Hp)))           # images per row tile
    if num_cores > 1:                                      # >=1 real tile per TC
        ipb = max(1, min(ipb, -(-N // num_cores)))
    while ipb > 1 and weight_bytes + act_bytes(ipb) > budget:
        ipb = max(1, ipb // 2)                             # shrink tm, never K/N
    n_blocks = -(-N // ipb)
    if num_cores > 1:                                      # even step count on 2-TC chips
        n_blocks = _round_up(n_blocks, num_cores)
    Np = n_blocks * ipb
    th = ipb * Hp
    rows = Np * Hp

    x_rows = x_img.reshape(N * Hp, Fin)
    if Np != N:
        x_rows = jnp.pad(x_rows, ((0, (Np - N) * Hp), (0, 0)))
    x_rows = x_rows.astype(compute_dtype)

    # ---- weights: matmul form, lane-padded to 128, streamed in compute_dtype
    def pad2(a, r, c):
        return jnp.pad(a, ((0, r - a.shape[0]), (0, c - a.shape[1])))

    # conv1 taps: W_k[f = w*2C + c, o] = w1[o, c, k, w]
    w1_taps = jnp.transpose(params["w1"], (2, 3, 1, 0)).reshape(fs, Fin, C1)
    w1_k = jnp.pad(w1_taps, ((0, 0), (0, 0), (0, C1p - C1))).astype(compute_dtype)
    b1 = jnp.pad(params["b1"], (0, C1p - C1)).reshape(1, C1p).astype(jnp.float32)

    def fused_fc(wk, cinp, coutp):
        # (1,2) conv acting on [pos | neg] -> one stacked (2*Cin, Cout) matmul.
        a = pad2(wk[:, :, 0, 0].T, cinp, coutp)
        c = pad2(wk[:, :, 0, 1].T, cinp, coutp)
        return jnp.concatenate([a, c], axis=0).astype(compute_dtype)

    w2 = fused_fc(params["w2"], C1p, C2p)
    b2 = jnp.pad(params["b2"], (0, C2p - C2)).reshape(1, C2p).astype(jnp.float32)
    w3 = fused_fc(params["w3"], C2p, C2p)
    b3 = jnp.pad(params["b3"], (0, C2p - C2)).reshape(1, C2p).astype(jnp.float32)
    w4 = fused_fc(params["w4"], C2p, C4p)
    b4 = jnp.pad(params["b4"], (0, C4p - C4)).reshape(1, C4p).astype(jnp.float32)

    # Constant-index weights/biases: never re-DMA'd -> single buffer.
    def wspec(shape):
        return pl.BlockSpec(shape, lambda i: (0,) * len(shape),
                            pipeline_mode=pl.Buffered(1))

    vmem_limit = int(min(max(weight_bytes + act_bytes(ipb) + (4 << 20),
                             16 << 20), budget))

    kernel = functools.partial(_aistap_fc_kernel, fs=fs, c1=C1, c2=C2)
    o_rows = pl.pallas_call(
        kernel,
        out_shape=jax.ShapeDtypeStruct((rows, C4p), jnp.float32),
        grid=(rows // th,),
        in_specs=[
            pl.BlockSpec((th, Fin), lambda i: (i, 0)),
            wspec((fs, Fin, C1p)), wspec((1, C1p)),
            wspec((2 * C1p, C2p)), wspec((1, C2p)),
            wspec((2 * C2p, C2p)), wspec((1, C2p)),
            wspec((2 * C2p, C4p)), wspec((1, C4p)),
        ],
        out_specs=pl.BlockSpec((th, C4p), lambda i: (i, 0)),
        compiler_params=pltpu.CompilerParams(
            dimension_semantics=("parallel",),
            vmem_limit_bytes=vmem_limit),
    )(x_rows, w1_k, b1, w2, b2, w3, b3, w4, b4)

    # torch: permute(0,2,3,1).view(in_shape_real) -> (N, H, W, 2C);
    # conv4 channel j maps to (w, c) = (j // 2C, j % 2C).
    x_out = (o_rows.reshape(Np, Hp, C4p)[:N, :H, :C4]
             .reshape(N, H, W, in_ch).astype(jnp.float32))
    if norm_output:
        nrm = jnp.sqrt(jnp.sum(x_out * x_out, axis=-1, keepdims=True))
        x_out = x_out / jnp.maximum(nrm, 1e-12)
    # view_complex (inverse of the view_real convention above)
    w_cplx = x_out[..., :C] + 1j * x_out[..., C:]
    out = w_cplx * x_in
    return out, w_cplx


# ------------- pure-JAX reference (mirrors the PyTorch NCHW code) -------------
def _antirect_nchw(x):
    m = jnp.mean(x, axis=(1, 3), keepdims=True)
    s = x - m
    n = jnp.sqrt(jnp.sum(s * s, axis=(1, 3), keepdims=True))
    z = s / jnp.maximum(n, 1e-12)
    return jnp.concatenate([jnp.maximum(z, 0.0), jnp.maximum(-z, 0.0)], axis=3)


def aistap_fc_reference(x_in, params, filter_size=3):
    N, H, W, C = x_in.shape
    xr = jnp.concatenate([jnp.real(x_in), jnp.imag(x_in)], axis=-1).astype(jnp.float32)
    in_shape_real = xr.shape
    x = jnp.transpose(xr, (0, 3, 1, 2))
    dn = ("NCHW", "OIHW", "NCHW")
    pad = filter_size // 2
    x = lax.conv_general_dilated(x, params["w1"], (1, 1), ((pad, pad), (0, 0)),
                                 dimension_numbers=dn) + params["b1"][None, :, None, None]
    x = _antirect_nchw(x)
    x = lax.conv_general_dilated(x, params["w2"], (1, 1), ((0, 0), (0, 0)),
                                 dimension_numbers=dn) + params["b2"][None, :, None, None]
    x = _antirect_nchw(x)
    x = lax.conv_general_dilated(x, params["w3"], (1, 1), ((0, 0), (0, 0)),
                                 dimension_numbers=dn) + params["b3"][None, :, None, None]
    x = _antirect_nchw(x)
    x = lax.conv_general_dilated(x, params["w4"], (1, 1), ((0, 0), (0, 0)),
                                 dimension_numbers=dn) + params["b4"][None, :, None, None]
    x = jnp.transpose(x, (0, 2, 3, 1)).reshape(in_shape_real)
    w = x[..., :C] + 1j * x[..., C:]
    return w * x_in, w


if __name__ == "__main__":
    key = jax.random.PRNGKey(0)
    # (batch N, range H, doppler W, complex channels C); W*2C must be divisible by 12
    N, H, W, C = 2, 16, 6, 2
    fs = 3
    k_x, k_p = jax.random.split(key)
    kr, ki = jax.random.split(k_x)
    x_in = (jax.random.normal(kr, (N, H, W, C), jnp.float32)
            + 1j * jax.random.normal(ki, (N, H, W, C), jnp.float32)).astype(jnp.complex64)
    params = init_params(k_p, (N, H, W, C), fs)

    out_ref, w_ref = aistap_fc_reference(x_in, params, fs)

    # Structural validation in f32 (tight tolerance).
    out32, w32 = aistap_fc_forward(x_in, params, noise_var=0.0, filter_size=fs,
                                   compute_dtype=jnp.float32)
    jax.block_until_ready((out32, w32))
    assert jnp.allclose(w32, w_ref, atol=2e-4, rtol=2e-4)
    assert jnp.allclose(out32, out_ref, atol=2e-4, rtol=2e-4)

    # Default bf16-streamed path (MXU-native; looser tolerance for bf16 streams).
    out, w = aistap_fc_forward(x_in, params, noise_var=0.0, filter_size=fs)
    jax.block_until_ready((out, w))
    assert jnp.allclose(w, w_ref, atol=5e-2, rtol=5e-2)
    assert jnp.allclose(out, out_ref, atol=5e-2, rtol=5e-2)

    print("KERNEL_OK")
</pallas_src>

<mosaic_0001>
module attributes {stable_mosaic.version = 11 : i64} {
  func.func @_aistap_fc_kernel(%arg0: i32, %arg1: memref<64x24xf32, #tpu.memory_space<vmem>>, %arg2: memref<3x24x128xf32, #tpu.memory_space<vmem>>, %arg3: memref<1x128xf32, #tpu.memory_space<vmem>>, %arg4: memref<256x128xf32, #tpu.memory_space<vmem>>, %arg5: memref<1x128xf32, #tpu.memory_space<vmem>>, %arg6: memref<256x128xf32, #tpu.memory_space<vmem>>, %arg7: memref<1x128xf32, #tpu.memory_space<vmem>>, %arg8: memref<256x128xf32, #tpu.memory_space<vmem>>, %arg9: memref<1x128xf32, #tpu.memory_space<vmem>>, %arg10: memref<64x128xf32, #tpu.memory_space<vmem>>) attributes {dimension_semantics = [#tpu.dimension_semantics<parallel>], iteration_bounds = array<i64: 1>, scalar_prefetch = 0 : i64, scratch_operands = 0 : i64, tpu.core_type = #tpu.core_type<tc>, window_params = [{transform_indices = @transform_0, window_bounds = array<i64: 64, 24>}, {pipeline_mode = #tpu.pipeline_mode<synchronous>, transform_indices = @transform_1, window_bounds = array<i64: 3, 24, 128>}, {pipeline_mode = #tpu.pipeline_mode<synchronous>, transform_indices = @transform_2, window_bounds = array<i64: 1, 128>}, {pipeline_mode = #tpu.pipeline_mode<synchronous>, transform_indices = @transform_3, window_bounds = array<i64: 256, 128>}, {pipeline_mode = #tpu.pipeline_mode<synchronous>, transform_indices = @transform_4, window_bounds = array<i64: 1, 128>}, {pipeline_mode = #tpu.pipeline_mode<synchronous>, transform_indices = @transform_5, window_bounds = array<i64: 256, 128>}, {pipeline_mode = #tpu.pipeline_mode<synchronous>, transform_indices = @transform_6, window_bounds = array<i64: 1, 128>}, {pipeline_mode = #tpu.pipeline_mode<synchronous>, transform_indices = @transform_7, window_bounds = array<i64: 256, 128>}, {pipeline_mode = #tpu.pipeline_mode<synchronous>, transform_indices = @transform_8, window_bounds = array<i64: 1, 128>}, {transform_indices = @transform_9, window_bounds = array<i64: 64, 128>}]} {
    %c0 = arith.constant 0 : index
    %c0_0 = arith.constant 0 : index
    %0 = vector.load %arg1[%c0, %c0_0] : memref<64x24xf32, #tpu.memory_space<vmem>>, vector<64x24xf32>
    %c0_1 = arith.constant 0 : index
    %c0_2 = arith.constant 0 : index
    %c0_3 = arith.constant 0 : index
    %1 = vector.load %arg2[%c0_1, %c0_2, %c0_3] : memref<3x24x128xf32, #tpu.memory_space<vmem>>, vector<1x24x128xf32>
    %2 = vector.shape_cast %1 : vector<1x24x128xf32> to vector<24x128xf32>
    %cst = arith.constant dense<0.000000e+00> : vector<64x128xf32>
    %3 = tpu.matmul %0, %2, %cst {dimension_numbers = #tpu.dot_dimension_numbers<[1], [0], [0], [1], [0, 0, 1, 1], [], []>} : vector<64x24xf32>, vector<24x128xf32>, vector<64x128xf32> -> vector<64x128xf32>
    %c1_i32 = arith.constant 1 : i32
    %4 = tpu.dynamic_rotate %3 by %c1_i32 dim 0 : vector<64x128xf32>, i32 -> vector<64x128xf32>
    %c1 = arith.constant 1 : index
    %c0_4 = arith.constant 0 : index
    %c0_5 = arith.constant 0 : index
    %5 = vector.load %arg2[%c1, %c0_4, %c0_5] : memref<3x24x128xf32, #tpu.memory_space<vmem>>, vector<1x24x128xf32>
    %6 = vector.shape_cast %5 : vector<1x24x128xf32> to vector<24x128xf32>
    %cst_6 = arith.constant dense<0.000000e+00> : vector<64x128xf32>
    %7 = tpu.matmul %0, %6, %cst_6 {dimension_numbers = #tpu.dot_dimension_numbers<[1], [0], [0], [1], [0, 0, 1, 1], [], []>} : vector<64x24xf32>, vector<24x128xf32>, vector<64x128xf32> -> vector<64x128xf32>
    %8 = arith.addf %4, %7 : vector<64x128xf32>
    %c2 = arith.constant 2 : index
    %c0_7 = arith.constant 0 : index
    %c0_8 = arith.constant 0 : index
    %9 = vector.load %arg2[%c2, %c0_7, %c0_8] : memref<3x24x128xf32, #tpu.memory_space<vmem>>, vector<1x24x128xf32>
    %10 = vector.shape_cast %9 : vector<1x24x128xf32> to vector<24x128xf32>
    %cst_9 = arith.constant dense<0.000000e+00> : vector<64x128xf32>
    %11 = tpu.matmul %0, %10, %cst_9 {dimension_numbers = #tpu.dot_dimension_numbers<[1], [0], [0], [1], [0, 0, 1, 1], [], []>} : vector<64x24xf32>, vector<24x128xf32>, vector<64x128xf32> -> vector<64x128xf32>
    %c63_i32 = arith.constant 63 : i32
    %12 = tpu.dynamic_rotate %11 by %c63_i32 dim 0 : vector<64x128xf32>, i32 -> vector<64x128xf32>
    %13 = arith.addf %8, %12 : vector<64x128xf32>
    %c0_10 = arith.constant 0 : index
    %c0_11 = arith.constant 0 : index
    %14 = vector.load %arg3[%c0_10, %c0_11] : memref<1x128xf32, #tpu.memory_space<vmem>>, vector<1x128xf32>
    %15 = vector.broadcast %14 : vector<1x128xf32> to vector<64x128xf32>
    %16 = arith.addf %13, %15 : vector<64x128xf32>
    %cst_12 = arith.constant dense<0.000000e+00> : vector<64xf32>
    %17 = vector.multi_reduction <add>, %16, %cst_12 [1] : vector<64x128xf32> to vector<64xf32>
    %18 = vector.shape_cast %17 : vector<64xf32> to vector<64x1xf32>
    %cst_13 = arith.constant 0.013888889 : f32
    %19 = vector.broadcast %cst_13 : f32 to vector<64x1xf32>
    %20 = arith.mulf %18, %19 : vector<64x1xf32>
    %21 = tpu.iota {dimensions = array<i32: 1>} : vector<64x128xi32>
    %c72_i32 = arith.constant 72 : i32
    %22 = vector.broadcast %c72_i32 : i32 to vector<64x128xi32>
    %23 = arith.cmpi slt, %21, %22 : vector<64x128xi32>
    %24 = vector.broadcast %20 : vector<64x1xf32> to vector<64x128xf32>
    %25 = arith.subf %16, %24 : vector<64x128xf32>
    %cst_14 = arith.constant 0.000000e+00 : f32
    %26 = vector.broadcast %cst_14 : f32 to vector<64x128xf32>
    %27 = arith.select %23, %25, %26 : vector<64x128xi1>, vector<64x128xf32>
    %28 = arith.mulf %27, %27 : vector<64x128xf32>
    %cst_15 = arith.constant dense<0.000000e+00> : vector<64xf32>
    %29 = vector.multi_reduction <add>, %28, %cst_15 [1] : vector<64x128xf32> to vector<64xf32>
    %30 = vector.shape_cast %29 : vector<64xf32> to vector<64x1xf32>
    %cst_16 = arith.constant 1.000000e-24 : f32
    %31 = vector.broadcast %cst_16 : f32 to vector<64x1xf32>
    %32 = arith.maximumf %30, %31 : vector<64x1xf32>
    %33 = math.rsqrt %32 : vector<64x1xf32>
    %34 = vector.broadcast %33 : vector<64x1xf32> to vector<64x128xf32>
    %35 = arith.mulf %27, %34 : vector<64x128xf32>
    %cst_17 = arith.constant 0.000000e+00 : f32
    %36 = vector.broadcast %cst_17 : f32 to vector<64x128xf32>
    %37 = arith.maximumf %35, %36 : vector<64x128xf32>
    %cst_18 = arith.constant 0.000000e+00 : f32
    %38 = vector.broadcast %cst_18 : f32 to vector<64x128xf32>
    %39 = arith.subf %38, %35 : vector<64x128xf32>
    %cst_19 = arith.constant 0.000000e+00 : f32
    %40 = vector.broadcast %cst_19 : f32 to vector<64x128xf32>
    %41 = arith.maximumf %39, %40 : vector<64x128xf32>
    %42 = tpu.concatenate %37, %41 in 1 : vector<64x128xf32>, vector<64x128xf32> -> vector<64x256xf32>
    %c0_20 = arith.constant 0 : index
    %c0_21 = arith.constant 0 : index
    %43 = vector.load %arg4[%c0_20, %c0_21] : memref<256x128xf32, #tpu.memory_space<vmem>>, vector<256x128xf32>
    %cst_22 = arith.constant dense<0.000000e+00> : vector<64x128xf32>
    %44 = tpu.matmul %42, %43, %cst_22 {dimension_numbers = #tpu.dot_dimension_numbers<[1], [0], [0], [1], [0, 0, 1, 1], [], []>} : vector<64x256xf32>, vector<256x128xf32>, vector<64x128xf32> -> vector<64x128xf32>
    %c0_23 = arith.constant 0 : index
    %c0_24 = arith.constant 0 : index
    %45 = vector.load %arg5[%c0_23, %c0_24] : memref<1x128xf32, #tpu.memory_space<vmem>>, vector<1x128xf32>
    %46 = vector.broadcast %45 : vector<1x128xf32> to vector<64x128xf32>
    %47 = arith.addf %44, %46 : vector<64x128xf32>
    %cst_25 = arith.constant dense<0.000000e+00> : vector<64xf32>
    %48 = vector.multi_reduction <add>, %47, %cst_25 [1] : vector<64x128xf32> to vector<64xf32>
    %49 = vector.shape_cast %48 : vector<64xf32> to vector<64x1xf32>
    %cst_26 = arith.constant 0.0833333358 : f32
    %50 = vector.broadcast %cst_26 : f32 to vector<64x1xf32>
    %51 = arith.mulf %49, %50 : vector<64x1xf32>
    %52 = tpu.iota {dimensions = array<i32: 1>} : vector<64x128xi32>
    %c12_i32 = arith.constant 12 : i32
    %53 = vector.broadcast %c12_i32 : i32 to vector<64x128xi32>
    %54 = arith.cmpi slt, %52, %53 : vector<64x128xi32>
    %55 = vector.broadcast %51 : vector<64x1xf32> to vector<64x128xf32>
    %56 = arith.subf %47, %55 : vector<64x128xf32>
    %cst_27 = arith.constant 0.000000e+00 : f32
    %57 = vector.broadcast %cst_27 : f32 to vector<64x128xf32>
    %58 = arith.select %54, %56, %57 : vector<64x128xi1>, vector<64x128xf32>
    %59 = arith.mulf %58, %58 : vector<64x128xf32>
    %cst_28 = arith.constant dense<0.000000e+00> : vector<64xf32>
    %60 = vector.multi_reduction <add>, %59, %cst_28 [1] : vector<64x128xf32> to vector<64xf32>
    %61 = vector.shape_cast %60 : vector<64xf32> to vector<64x1xf32>
    %cst_29 = arith.constant 1.000000e-24 : f32
    %62 = vector.broadcast %cst_29 : f32 to vector<64x1xf32>
    %63 = arith.maximumf %61, %62 : vector<64x1xf32>
    %64 = math.rsqrt %63 : vector<64x1xf32>
    %65 = vector.broadcast %64 : vector<64x1xf32> to vector<64x128xf32>
    %66 = arith.mulf %58, %65 : vector<64x128xf32>
    %cst_30 = arith.constant 0.000000e+00 : f32
    %67 = vector.broadcast %cst_30 : f32 to vector<64x128xf32>
    %68 = arith.maximumf %66, %67 : vector<64x128xf32>
    %cst_31 = arith.constant 0.000000e+00 : f32
    %69 = vector.broadcast %cst_31 : f32 to vector<64x128xf32>
    %70 = arith.subf %69, %66 : vector<64x128xf32>
    %cst_32 = arith.constant 0.000000e+00 : f32
    %71 = vector.broadcast %cst_32 : f32 to vector<64x128xf32>
    %72 = arith.maximumf %70, %71 : vector<64x128xf32>
    %73 = tpu.concatenate %68, %72 in 1 : vector<64x128xf32>, vector<64x128xf32> -> vector<64x256xf32>
    %c0_33 = arith.constant 0 : index
    %c0_34 = arith.constant 0 : index
    %74 = vector.load %arg6[%c0_33, %c0_34] : memref<256x128xf32, #tpu.memory_space<vmem>>, vector<256x128xf32>
    %cst_35 = arith.constant dense<0.000000e+00> : vector<64x128xf32>
    %75 = tpu.matmul %73, %74, %cst_35 {dimension_numbers = #tpu.dot_dimension_numbers<[1], [0], [0], [1], [0, 0, 1, 1], [], []>} : vector<64x256xf32>, vector<256x128xf32>, vector<64x128xf32> -> vector<64x128xf32>
    %c0_36 = arith.constant 0 : index
    %c0_37 = arith.constant 0 : index
    %76 = vector.load %arg7[%c0_36, %c0_37] : memref<1x128xf32, #tpu.memory_space<vmem>>, vector<1x128xf32>
    %77 = vector.broadcast %76 : vector<1x128xf32> to vector<64x128xf32>
    %78 = arith.addf %75, %77 : vector<64x128xf32>
    %cst_38 = arith.constant dense<0.000000e+00> : vector<64xf32>
    %79 = vector.multi_reduction <add>, %78, %cst_38 [1] : vector<64x128xf32> to vector<64xf32>
    %80 = vector.shape_cast %79 : vector<64xf32> to vector<64x1xf32>
    %cst_39 = arith.constant 0.0833333358 : f32
    %81 = vector.broadcast %cst_39 : f32 to vector<64x1xf32>
    %82 = arith.mulf %80, %81 : vector<64x1xf32>
    %83 = tpu.iota {dimensions = array<i32: 1>} : vector<64x128xi32>
    %c12_i32_40 = arith.constant 12 : i32
    %84 = vector.broadcast %c12_i32_40 : i32 to vector<64x128xi32>
    %85 = arith.cmpi slt, %83, %84 : vector<64x128xi32>
    %86 = vector.broadcast %82 : vector<64x1xf32> to vector<64x128xf32>
    %87 = arith.subf %78, %86 : vector<64x128xf32>
    %cst_41 = arith.constant 0.000000e+00 : f32
    %88 = vector.broadcast %cst_41 : f32 to vector<64x128xf32>
    %89 = arith.select %85, %87, %88 : vector<64x128xi1>, vector<64x128xf32>
    %90 = arith.mulf %89, %89 : vector<64x128xf32>
    %cst_42 = arith.constant dense<0.000000e+00> : vector<64xf32>
    %91 = vector.multi_reduction <add>, %90, %cst_42 [1] : vector<64x128xf32> to vector<64xf32>
    %92 = vector.shape_cast %91 : vector<64xf32> to vector<64x1xf32>
    %cst_43 = arith.constant 1.000000e-24 : f32
    %93 = vector.broadcast %cst_43 : f32 to vector<64x1xf32>
    %94 = arith.maximumf %92, %93 : vector<64x1xf32>
    %95 = math.rsqrt %94 : vector<64x1xf32>
    %96 = vector.broadcast %95 : vector<64x1xf32> to vector<64x128xf32>
    %97 = arith.mulf %89, %96 : vector<64x128xf32>
    %cst_44 = arith.constant 0.000000e+00 : f32
    %98 = vector.broadcast %cst_44 : f32 to vector<64x128xf32>
    %99 = arith.maximumf %97, %98 : vector<64x128xf32>
    %cst_45 = arith.constant 0.000000e+00 : f32
    %100 = vector.broadcast %cst_45 : f32 to vector<64x128xf32>
    %101 = arith.subf %100, %97 : vector<64x128xf32>
    %cst_46 = arith.constant 0.000000e+00 : f32
    %102 = vector.broadcast %cst_46 : f32 to vector<64x128xf32>
    %103 = arith.maximumf %101, %102 : vector<64x128xf32>
    %104 = tpu.concatenate %99, %103 in 1 : vector<64x128xf32>, vector<64x128xf32> -> vector<64x256xf32>
    %c0_47 = arith.constant 0 : index
    %c0_48 = arith.constant 0 : index
    %105 = vector.load %arg8[%c0_47, %c0_48] : memref<256x128xf32, #tpu.memory_space<vmem>>, vector<256x128xf32>
    %cst_49 = arith.constant dense<0.000000e+00> : vector<64x128xf32>
    %106 = tpu.matmul %104, %105, %cst_49 {dimension_numbers = #tpu.dot_dimension_numbers<[1], [0], [0], [1], [0, 0, 1, 1], [], []>} : vector<64x256xf32>, vector<256x128xf32>, vector<64x128xf32> -> vector<64x128xf32>
    %c0_50 = arith.constant 0 : index
    %c0_51 = arith.constant 0 : index
    %107 = vector.load %arg9[%c0_50, %c0_51] : memref<1x128xf32, #tpu.memory_space<vmem>>, vector<1x128xf32>
    %108 = vector.broadcast %107 : vector<1x128xf32> to vector<64x128xf32>
    %109 = arith.addf %106, %108 : vector<64x128xf32>
    %c0_52 = arith.constant 0 : index
    %c0_53 = arith.constant 0 : index
    %110 = vector.load %arg10[%c0_52, %c0_53] : memref<64x128xf32, #tpu.memory_space<vmem>>, vector<64x128xf32>
    tpu.vector_store %arg10[%c0_52, %c0_53], %109 {strides = array<i32>} : memref<64x128xf32, #tpu.memory_space<vmem>>, vector<64x128xf32>,
    return
  }
  func.func @transform_0(%arg0: i32) -> (i32, i32) {
    %c0_i32 = arith.constant 0 : i32
    %c0_i32_0 = arith.constant 0 : i32
    return %arg0, %c0_i32 : i32, i32
  }
  func.func @transform_1(%arg0: i32) -> (i32, i32, i32) {
    %c0_i32 = arith.constant 0 : i32
    %c0_i32_0 = arith.constant 0 : i32
    %c0_i32_1 = arith.constant 0 : i32
    %c0_i32_2 = arith.constant 0 : i32
    return %c0_i32, %c0_i32_0, %c0_i32_1 : i32, i32, i32
  }
  func.func @transform_2(%arg0: i32) -> (i32, i32) {
    %c0_i32 = arith.constant 0 : i32
    %c0_i32_0 = arith.constant 0 : i32
    %c0_i32_1 = arith.constant 0 : i32
    return %c0_i32, %c0_i32_0 : i32, i32
  }
  func.func @transform_3(%arg0: i32) -> (i32, i32) {
    %c0_i32 = arith.constant 0 : i32
    %c0_i32_0 = arith.constant 0 : i32
    %c0_i32_1 = arith.constant 0 : i32
    return %c0_i32, %c0_i32_0 : i32, i32
  }
  func.func @transform_4(%arg0: i32) -> (i32, i32) {
    %c0_i32 = arith.constant 0 : i32
    %c0_i32_0 = arith.constant 0 : i32
    %c0_i32_1 = arith.constant 0 : i32
    return %c0_i32, %c0_i32_0 : i32, i32
  }
  func.func @transform_5(%arg0: i32) -> (i32, i32) {
    %c0_i32 = arith.constant 0 : i32
    %c0_i32_0 = arith.constant 0 : i32
    %c0_i32_1 = arith.constant 0 : i32
    return %c0_i32, %c0_i32_0 : i32, i32
  }
  func.func @transform_6(%arg0: i32) -> (i32, i32) {
    %c0_i32 = arith.constant 0 : i32
    %c0_i32_0 = arith.constant 0 : i32
    %c0_i32_1 = arith.constant 0 : i32
    return %c0_i32, %c0_i32_0 : i32, i32
  }
  func.func @transform_7(%arg0: i32) -> (i32, i32) {
    %c0_i32 = arith.constant 0 : i32
    %c0_i32_0 = arith.constant 0 : i32
    %c0_i32_1 = arith.constant 0 : i32
    return %c0_i32, %c0_i32_0 : i32, i32
  }
  func.func @transform_8(%arg0: i32) -> (i32, i32) {
    %c0_i32 = arith.constant 0 : i32
    %c0_i32_0 = arith.constant 0 : i32
    %c0_i32_1 = arith.constant 0 : i32
    return %c0_i32, %c0_i32_0 : i32, i32
  }
  func.func @transform_9(%arg0: i32) -> (i32, i32) {
    %c0_i32 = arith.constant 0 : i32
    %c0_i32_0 = arith.constant 0 : i32
    return %arg0, %c0_i32 : i32, i32
  }
}

</mosaic_0001>

<bundles_post_ra>
// kernel: tpu_custom_call.1
= control target key start
LH: loop header
LB: loop body
LE: loop exit
PB: predicated region body
PF: predicated region fallthrough
CT: control target
= control target key end

     0   :  { %14 = vsyncpa [#allocation3], 0  ;;  %s2227_s0 = inlined_call_operand.vmem [shape: f32[64,24], index: 0, kind: input, shape index: {}]   ;;  %s2228_s1 = inlined_call_operand.vmem [shape: f32[3,24,128], index: 1, kind: input, shape index: {}]   ;;  %s2229_s2 = inlined_call_operand.vmem [shape: f32[1,128], index: 2, kind: input, shape index: {}]   ;;  %s2230_s3 = inlined_call_operand.hbm [shape: f32[256,128], index: 3, kind: input, shape index: {}]   ;;  %s2231_s4 = inlined_call_operand.vmem [shape: f32[1,128], index: 4, kind: input, shape index: {}]   ;;  %s2232_s5 = inlined_call_operand.hbm [shape: f32[256,128], index: 5, kind: input, shape index: {}]   ;;  %s2233_s6 = inlined_call_operand.vmem [shape: f32[1,128], index: 6, kind: input, shape index: {}]   ;;  %s2234_s7 = inlined_call_operand.hbm [shape: f32[256,128], index: 7, kind: input, shape index: {}]   ;;  %s2235_s8 = inlined_call_operand.vmem [shape: f32[1,128], index: 8, kind: input, shape index: {}]   ;;  %s2236_s9 = inlined_call_operand.hbm [shape: f32[64,128], index: 9, kind: output, shape index: {}]  }
   0x1   :  { %15 = vsyncpa [#allocation6], 0 }
   0x2   :  { %16 = vsyncpa [#allocation4], 0  ;;  %s1759_s30 = smov [#allocation5]   ;;  %s1760_s11 = smov [#allocation2]  }
   0x3   :  { %s42_s10 = sshll.u32 %s1759_s30, 4  ;;  %s28_s12 = sshll.u32 %s1760_s11, 4  ;;  %s43_s10 = int_to_ptr.vmem [resolvable:$true] %s42_s10  ;;  %s29_s12 = int_to_ptr.vmem [resolvable:$true] %s28_s12 }
   0x4   :  { %s1681_s13 = scalar_lea.vmem %s43_s10, 4096  ;;  %p1686_p1 = scmp.lt.s32.totalorder %s43_s10, %s43_s10 }
   0x5   :  { %p1682_p0 = scmp.ne.s32.totalorder %s43_s10, %s1681_s13  ;;  %p1687_p2 = scmp.lt.s32.totalorder %s1681_s13, %s1681_s13 }
   0x7   :  { %p1688_p3 = por %p1687_p2, %p1686_p1 }
   0x9   :  { %p1689_p4 = pnand %p1688_p3, %p1682_p0 }
   0xb   :  { %1692 = shalt.err (!%p1689_p4)
}
   0xc   :  { %s1761_s14 = smov 128   ;;  %s1762_s15 = smov 8  }
   0xd   :  { %48 = dma.hbm_to_vmem [thread:$0]  %s2232_s5, 4096, %s43_s10, [#allocation6], %s1761_s14, %s1761_s14, %s1762_s15  }
   0xe   :  { %s1701_s18 = scalar_lea.vmem %s29_s12, 4096  ;;  %p1706_p6 = scmp.lt.s32.totalorder %s29_s12, %s29_s12 }
   0xf   :  { %p1702_p5 = scmp.ne.s32.totalorder %s29_s12, %s1701_s18  ;;  %p1707_p7 = scmp.lt.s32.totalorder %s1701_s18, %s1701_s18 }
  0x11   :  { %p1708_p8 = por %p1707_p7, %p1706_p6 }
  0x13   :  { %p1709_p9 = pnand %p1708_p8, %p1702_p5 }
  0x15   :  { %1712 = shalt.err (!%p1709_p9)
}
  0x16   :  { %34 = dma.hbm_to_vmem [thread:$0]  %s2230_s3, 4096, %s29_s12, [#allocation3], %s1761_s14, %s1761_s14, %s1762_s15  }
  0x17   :  { %s1763_s21 = smov [#allocation7]  }
  0x18   :  { %s56_s22 = sshll.u32 %s1763_s21, 4  ;;  %s57_s22 = int_to_ptr.vmem [resolvable:$true] %s56_s22 }
  0x19   :  { %s1721_s23 = scalar_lea.vmem %s57_s22, 4096  ;;  %p1726_p11 = scmp.lt.s32.totalorder %s57_s22, %s57_s22 }
  0x1a   :  { %p1722_p10 = scmp.ne.s32.totalorder %s57_s22, %s1721_s23  ;;  %p1727_p12 = scmp.lt.s32.totalorder %s1721_s23, %s1721_s23 }
  0x1c   :  { %p1728_p13 = por %p1727_p12, %p1726_p11 }
  0x1e   :  { %p1729_p0 = pnand %p1728_p13, %p1722_p10 }
  0x20   :  { %1732 = shalt.err (!%p1729_p0)
}
  0x21   :  { %62 = dma.hbm_to_vmem [thread:$0]  %s2234_s7, 4096, %s57_s22, [#allocation6], %s1761_s14, %s1761_s14, %s1762_s15  }
  0x22   :  { %1753 = dma.done.wait [#allocation3], 4096  }
  0x23   :  { %1754 = vsyncadd [#allocation3], 4294963200 }
  0x24   :  { %1755 = dma.done.wait [#allocation6], 8192  }
  0x25   :  { %1756 = vsyncadd [#allocation6], 4294959104  ;;  %v84_v0 = vld [vmem:[%s2228_s1 + $0x10] sm:$0xff]  ;;  %v83_v1 = vld [vmem:[%s2228_s1 + $0x8] sm:$0xff]  ;;  %vm85_vm0 = vcmask 195584   ;;  %v223_v23 = vlaneseq }
  0x26   :  { %v1308_v2 = vld [vmem:[%s2228_s1 + $0x28] sm:$0xff]  ;;  %1533 = vmatprep.subr.mxu0 %v84_v0  ;;  %v74_v3 = vld [vmem:[%s2227_s0] sm:$0xff]  ;;  %v1306_v6 = vld [vmem:[%s2228_s1 + $0x18] sm:$0xff] }
  0x27   :  { %1551 = vmatprep.subr.mxu1 %v1308_v2  ;;  %v1307_v4 = vld [vmem:[%s2228_s1 + $0x20] sm:$0xff]  ;;  %1534 = vmatpush3.msra.mxu0 %v84_v0  ;;  %v75_v7 = vld [vmem:[%s2227_s0 + $0x8] sm:$0xff]  ;;  %v76_v9 = vld [vmem:[%s2227_s0 + $0x10] sm:$0xff]  ;;  %v1909_v27 = vshrl.u32 %v223_v23, 7 }
  0x28   :  { %v82_v5 = vld [vmem:[%s2228_s1] sm:$0xff]  ;;  %1552 = vmatpush3.msra.mxu1 %v1308_v2  ;;  %1535 = vmatprep.subr.mxu0 %v83_v1  ;;  %v1318_v10 = vld [vmem:[%s2228_s1 + $0x38] sm:$0xff]  ;;  %v1317_v13 = vld [vmem:[%s2228_s1 + $0x30] sm:$0xff] }
  0x29   :  { %1539 = vmatprep.mubr.msk.f32.mxu0 %vm85_vm0, %v74_v3  ;;  %1536 = vmatpush3.msra.mxu0 %v83_v1  ;;  %v1319_v8 = vld [vmem:[%s2228_s1 + $0x40] sm:$0xff]  ;;  %v77_v11 = vld [vmem:[%s2227_s0 + $0x18] sm:$0xff]  ;;  %v79_v14 = vld [vmem:[%s2227_s0 + $0x28] sm:$0xff]  ;;  %vm225_vm1 = vcmp.lt.s32.totalorder %v1909_v27, 1  ;;  %vm468_vm2 = vcmp.lt.s32.totalorder %v1909_v27, 7 }
  0x2a   :  { %1553 = vmatprep.subr.mxu1 %v1307_v4  ;;  %1537 = vmatprep.subr.mxu0 %v82_v5  ;;  %v78_v12 = vld [vmem:[%s2227_s0 + $0x20] sm:$0xff]  ;;  %v80_v15 = vld [vmem:[%s2227_s0 + $0x30] sm:$0xff]  ;;  %v81_v16 = vld [vmem:[%s2227_s0 + $0x38] sm:$0xff] }
  0x2b   :  { %1554 = vmatpush3.msra.mxu1 %v1307_v4  ;;  %1538 = vmatpush3.msra.mxu0 %v82_v5  ;;  %v1328_v48 = vld [vmem:[%s2229_s2] ss:$0 sm:$0xff]  ;;  %v646_v27 = vld [vmem:[#allocation2 + $0xf8] sm:$0xff] }
  0x2c   :  { %1555 = vmatprep.subr.mxu1 %v1306_v6  ;;  %1540 = vmatmul.mubr.msk.f32.vlgmr.msra.gmra.mxu0 %vm85_vm0, %v75_v7 }
  0x2d   :  { %1569 = vmatprep.subr.mxu0 %v1319_v8  ;;  %1556 = vmatpush3.msra.mxu1 %v1306_v6 }
  0x2e   :  { %1570 = vmatpush3.msra.mxu0 %v1319_v8  ;;  %1557 = vmatprep.mubr.msk.f32.mxu1 %vm85_vm0, %v74_v3 }
  0x2f   :  { %1542 = vmatprep.mubr.msk.f32.mxu0 %vm85_vm0, %v76_v9  ;;  %1558 = vmatmul.mubr.msk.f32.vlgmr.msra.gmra.mxu1 %vm85_vm0, %v75_v7 }
  0x30   :  { %1571 = vmatprep.subr.mxu0 %v1318_v10  ;;  %1543 = vmatmul.mubr.msk.f32.gmra.mxu0 %vm85_vm0, %v77_v11 }
  0x31   :  { %1560 = vmatprep.mubr.msk.f32.mxu1 %vm85_vm0, %v76_v9  ;;  %1545 = vmatprep.mubr.msk.f32.mxu0 %vm85_vm0, %v78_v12 }
  0x32   :  { %1572 = vmatpush3.msra.mxu0 %v1318_v10  ;;  %1365 = vmatprep.subr.mxu1 %v646_v27  ;;  %v619_v27 = vld [vmem:[#allocation2 + $0x20] sm:$0xff] }
  0x33   :  { %1573 = vmatprep.subr.mxu0 %v1317_v13  ;;  %1561 = vmatmul.mubr.msk.f32.gmra.mxu1 %vm85_vm0, %v77_v11 }
  0x34   :  { %1574 = vmatpush3.msra.mxu0 %v1317_v13  ;;  %1563 = vmatprep.mubr.msk.f32.mxu1 %vm85_vm0, %v78_v12 }
  0x35   :  { %1546 = vmatmul.mubr.msk.f32.gmra.mxu0 %vm85_vm0, %v79_v14 }
  0x36   :  { %1548 = vmatprep.mubr.msk.f32.mxu0 %vm85_vm0, %v80_v15 }
  0x37   :  { %1564 = vmatmul.mubr.msk.f32.gmra.mxu1 %vm85_vm0, %v79_v14 }
  0x38   :  { %1566 = vmatprep.mubr.msk.f32.mxu1 %vm85_vm0, %v80_v15 }
  0x39   :  { %1549 = vmatmul.mubr.msk.f32.gmra.mxu0 %vm85_vm0, %v81_v16 }
  0x3a   :  { %1575 = vmatprep.mubr.msk.f32.mxu0 %vm85_vm0, %v74_v3 }
  0x3b   :  { %1567 = vmatmul.mubr.msk.f32.gmra.mxu1 %vm85_vm0, %v81_v16 }
  0x3d   :  { %1576 = vmatmul.mubr.msk.f32.vlgmr.msra.gmra.mxu0 %vm85_vm0, %v75_v7 }
  0x3e   :  { %1578 = vmatprep.mubr.msk.f32.mxu0 %vm85_vm0, %v76_v9 }
  0x41   :  { %1579 = vmatmul.mubr.msk.f32.gmra.mxu0 %vm85_vm0, %v77_v11 }
  0x42   :  { %1581 = vmatprep.mubr.msk.f32.mxu0 %vm85_vm0, %v78_v12 }
  0x45   :  { %1582 = vmatmul.mubr.msk.f32.gmra.mxu0 %vm85_vm0, %v79_v14 }
  0x46   :  { %1584 = vmatprep.mubr.msk.f32.mxu0 %vm85_vm0, %v80_v15 }
  0x49   :  { %1585 = vmatmul.mubr.msk.f32.gmra.mxu0 %vm85_vm0, %v81_v16 }
  0xec   :  { %v1541_v17 = vpop.f32.mrf.mxu0 }
  0xed   :  { %v216_v37 = vrot.slane %v1541_v17, 7 }
  0xee   :  { %v176_v18 = vpop.f32.mrf.mxu0 }
  0xef   :  { %v1559_v19 = vpop.f32.mrf.mxu1  ;;  %v215_v32 = vrot.slane %v176_v18, 7 }
  0xf0   :  { %v1544_v20 = vpop.f32.mrf.mxu0 }
  0xf1   :  { %v304_v21 = vpop.f32.mrf.mxu1  ;;  %v232_v41 = vsel %vm225_vm1, %v215_v32, %v216_v37  ;;  %v218_v49 = vrot.slane %v1544_v20, 7 }
  0xf2   :  { %v186_v22 = vpop.f32.mrf.mxu0  ;;  %v344_v52 = vadd.f32 %v1559_v19, %v232_v41  ;;  %v644_v41 = vld [vmem:[#allocation2 + $0xe8] sm:$0xff] }
  0xf3   :  { %v1562_v25 = vpop.f32.mrf.mxu1  ;;  %v217_v34 = vrot.slane %v186_v22, 7 }
  0xf5   :  { %v1547_v24 = vpop.f32.mrf.mxu0  ;;  %v314_v29 = vpop.f32.mrf.mxu1  ;;  %v231_v45 = vsel %vm225_vm1, %v216_v37, %v217_v34  ;;  %v230_v55 = vsel %vm225_vm1, %v217_v34, %v218_v49 }
  0xf6   :  { %v345_v56 = vadd.f32 %v314_v29, %v231_v45  ;;  %v220_v1 = vrot.slane %v1547_v24, 7  ;;  %v346_v5 = vadd.f32 %v1562_v25, %v230_v55  ;;  %v642_v45 = vld [vmem:[#allocation2 + $0xd8] sm:$0xff] }
  0xf7   :  { %v196_v26 = vpop.f32.mrf.mxu0  ;;  %v1565_v35 = vpop.f32.mrf.mxu1 }
  0xf8   :  { %v219_v42 = vrot.slane %v196_v26, 7 }
  0xf9   :  { %v1911_v28 = vpop.f32.mrf.mxu0  ;;  %v324_v46 = vpop.f32.mrf.mxu1 }
  0xfa   :  { %v222_v30 = vrot.slane %v1911_v28, 7  ;;  %v229_v57 = vsel %vm225_vm1, %v218_v49, %v219_v42  ;;  %v228_v7 = vsel %vm225_vm1, %v219_v42, %v220_v1  ;;  %v628_v42 = vld [vmem:[#allocation2 + $0x68] sm:$0xff] }
  0xfb   :  { %v206_v31 = vpop.f32.mrf.mxu0  ;;  %v1568_v61 = vpop.f32.mrf.mxu1  ;;  %v347_v8 = vadd.f32 %v324_v46, %v229_v57  ;;  %v348_v22 = vadd.f32 %v1565_v35, %v228_v7  ;;  %v1976_v46 = vand.u32 127, %v223_v23 }
  0xfc   :  { %v233_v36 = vsel %vm225_vm1, %v222_v30, %v215_v32  ;;  %v221_v60 = vrot.slane %v206_v31, 7 }
  0xfd   :  { %v1577_v33 = vpop.f32.mrf.mxu0  ;;  %v343_v44 = vadd.f32 %v304_v21, %v233_v36  ;;  %v334_v13 = vpop.f32.mrf.mxu1  ;;  %vm526_vm3 = vcmp.lt.s32.totalorder %v1976_v46, 72  ;;  %vm783_vm4 = vcmp.lt.s32.totalorder %v1976_v46, 12  ;;  %v1133_v46 = vld [vmem:[#allocation7 + $0x28] sm:$0xff] }
  0xfe   :  { %v461_v39 = vrot.slane %v1577_v33, 1  ;;  %v227_v12 = vsel %vm225_vm1, %v220_v1, %v221_v60  ;;  %v226_v20 = vsel %vm225_vm1, %v221_v60, %v222_v30 }
  0xff   :  { %v421_v38 = vpop.f32.mrf.mxu0  ;;  %v349_v24 = vadd.f32 %v334_v13, %v227_v12  ;;  %v350_v32 = vadd.f32 %v1568_v61, %v226_v20  ;;  %v641_v20 = vld [vmem:[#allocation2 + $0xd0] sm:$0xff] }
 0x100   :  { %v460_v40 = vrot.slane %v421_v38, 1  ;;  %v630_v38 = vld [vmem:[#allocation2 + $0x78] sm:$0xff] }
 0x101   :  { %v1580_v43 = vpop.f32.mrf.mxu0  ;;  %1366 = vmatpush3.msra.mxu1 %v630_v38  ;;  %v634_v38 = vld [vmem:[#allocation2 + $0x98] sm:$0xff] }
 0x102   :  { %v475_v47 = vsel %vm468_vm2, %v460_v40, %v461_v39  ;;  %v463_v53 = vrot.slane %v1580_v43, 1  ;;  %v643_v43 = vld [vmem:[#allocation2 + $0xe0] sm:$0xff] }
 0x103   :  { %v431_v50 = vpop.f32.mrf.mxu0  ;;  %v477_v51 = vadd.f32 %v475_v47, %v343_v44  ;;  %v627_v44 = vld [vmem:[#allocation2 + $0x60] sm:$0xff] }
 0x104   :  { %v462_v54 = vrot.slane %v431_v50, 1 }
 0x105   :  { %v1583_v58 = vpop.f32.mrf.mxu0  ;;  %v1931_v59 = vadd.f32 %v1328_v48, %v477_v51 }
 0x106   :  { %v465_v62 = vrot.slane %v1583_v58, 1  ;;  %v474_v63 = vsel %vm468_vm2, %v461_v39, %v462_v54  ;;  %v473_v0 = vsel %vm468_vm2, %v462_v54, %v463_v53  ;;  %v645_v39 = vld [vmem:[#allocation2 + $0xf0] sm:$0xff] }
 0x107   :  { %500 = vadd.xlane.f32.xlu0 %v1931_v59  ;;  %v441_v2 = vpop.f32.mrf.mxu0  ;;  %v478_v3 = vadd.f32 %v474_v63, %v344_v52  ;;  %v479_v4 = vadd.f32 %v473_v0, %v345_v56  ;;  %1367 = vmatprep.subr.mxu1 %v645_v39  ;;  %v618_v39 = vld [vmem:[#allocation2 + $0x18] sm:$0xff] }
 0x108   :  { %v464_v6 = vrot.slane %v441_v2, 1 }
 0x109   :  { %v1586_v9 = vpop.f32.mrf.mxu0  ;;  %v1940_v10 = vadd.f32 %v1328_v48, %v478_v3  ;;  %v1942_v11 = vadd.f32 %v1328_v48, %v479_v4 }
 0x10a   :  { %v467_v14 = vrot.slane %v1586_v9, 1  ;;  %v472_v15 = vsel %vm468_vm2, %v463_v53, %v464_v6  ;;  %v471_v16 = vsel %vm468_vm2, %v464_v6, %v465_v62 }
 0x10b   :  { %502 = vadd.xlane.f32.xlu0 %v1940_v10  ;;  %504 = vadd.xlane.f32.xlu1 %v1942_v11  ;;  %v451_v17 = vpop.f32.mrf.mxu0  ;;  %v480_v18 = vadd.f32 %v472_v15, %v346_v5  ;;  %v481_v19 = vadd.f32 %v471_v16, %v347_v8 }
 0x10c   :  { %v466_v21 = vrot.slane %v451_v17, 1  ;;  %v476_v31 = vsel %vm468_vm2, %v467_v14, %v460_v40  ;;  %v629_v40 = vld [vmem:[#allocation2 + $0x70] sm:$0xff]  ;;  %v626_v17 = vld [vmem:[#allocation2 + $0x58] sm:$0xff] }
 0x10d   :  { %v1954_v25 = vadd.f32 %v1328_v48, %v480_v18  ;;  %v1956_v26 = vadd.f32 %v1328_v48, %v481_v19  ;;  %v484_v36 = vadd.f32 %v476_v31, %v350_v32  ;;  %1368 = vmatpush3.msra.mxu1 %v629_v40  ;;  %v623_v31 = vld [vmem:[#allocation2 + $0x40] sm:$0xff]  ;;  %v638_v32 = vld [vmem:[#allocation2 + $0xb8] sm:$0xff]  ;;  %v633_v40 = vld [vmem:[#allocation2 + $0x90] sm:$0xff] }
 0x10e   :  { %v470_v28 = vsel %vm468_vm2, %v465_v62, %v466_v21  ;;  %v469_v29 = vsel %vm468_vm2, %v466_v21, %v467_v14  ;;  %1369 = vmatprep.subr.mxu1 %v644_v41  ;;  %v617_v41 = vld [vmem:[#allocation2 + $0x10] sm:$0xff] }
 0x10f   :  { %506 = vadd.xlane.f32.xlu1 %v1954_v25  ;;  %508 = vadd.xlane.f32.xlu0 %v1956_v26  ;;  %v482_v30 = vadd.f32 %v470_v28, %v348_v22  ;;  %v483_v33 = vadd.f32 %v469_v29, %v349_v24  ;;  %v1972_v37 = vadd.f32 %v1328_v48, %v484_v36  ;;  %v625_v22 = vld [vmem:[#allocation2 + $0x50] sm:$0xff]  ;;  %v640_v24 = vld [vmem:[#allocation2 + $0xc8] sm:$0xff]  ;;  %v639_v29 = vld [vmem:[#allocation2 + $0xc0] sm:$0xff] }
 0x110   :  { %1370 = vmatpush3.msra.mxu1 %v628_v42  ;;  %v624_v28 = vld [vmem:[#allocation2 + $0x48] sm:$0xff] }
 0x111   :  { %v1966_v34 = vadd.f32 %v1328_v48, %v482_v30  ;;  %v1968_v35 = vadd.f32 %v1328_v48, %v483_v33  ;;  %1371 = vmatprep.subr.mxu1 %v643_v43  ;;  %v622_v30 = vld [vmem:[#allocation2 + $0x38] sm:$0xff]  ;;  %v637_v33 = vld [vmem:[#allocation2 + $0xb0] sm:$0xff]  ;;  %v620_v36 = vld [vmem:[#allocation2 + $0x28] sm:$0xff] }
 0x112   :  { %1372 = vmatpush3.msra.mxu1 %v627_v44  ;;  %v632_v42 = vld [vmem:[#allocation2 + $0x88] sm:$0xff]  ;;  %v631_v44 = vld [vmem:[#allocation2 + $0x80] sm:$0xff] }
 0x113   :  { %510 = vadd.xlane.f32.xlu1 %v1966_v34  ;;  %512 = vadd.xlane.f32.xlu0 %v1968_v35  ;;  %v616_v43 = vld [vmem:[#allocation2 + $0x8] sm:$0xff] }
 0x114   :  { %1373 = vmatprep.subr.mxu1 %v642_v45  ;;  %v615_v45 = vld [vmem:[#allocation2] sm:$0xff] }
 0x115   :  { %1374 = vmatpush3.msra.mxu1 %v626_v17 }
 0x116   :  { %1375 = vmatprep.subr.mxu1 %v641_v20 }
 0x117   :  { %514 = vadd.xlane.f32.xlu1 %v1972_v37  ;;  %1376 = vmatpush3.msra.mxu1 %v625_v22 }
 0x118   :  { %1377 = vmatprep.subr.mxu1 %v640_v24 }
 0x119   :  { %1378 = vmatpush3.msra.mxu1 %v624_v28 }
 0x11a   :  { %1379 = vmatprep.subr.mxu1 %v639_v29 }
 0x11b   :  { %1380 = vmatpush3.msra.mxu1 %v623_v31 }
 0x11c   :  { %1381 = vmatprep.subr.mxu1 %v638_v32 }
 0x11d   :  { %1382 = vmatpush3.msra.mxu1 %v622_v30 }
 0x11e   :  { %1383 = vmatprep.subr.mxu1 %v637_v33 }
 0x190   :  { %v501_v47 = vpop.xlane.xlu0 %500 }
 0x191   :  { %v516_v48 = vmul.f32 0.013888889, %v501_v47 }
 0x193   :  { %v527_v49 = vsub.f32 %v1931_v59, %v516_v48 }
 0x194   :  { %v503_v50 = vpop.xlane.xlu0 %502  ;;  %v505_v51 = vpop.xlane.xlu1 %504 }
 0x195   :  { %v517_v52 = vmul.f32 0.013888889, %v503_v50  ;;  %v518_v53 = vmul.f32 0.013888889, %v505_v51  ;;  %v1982_v54 = vsel %vm526_vm3, %v527_v49, 0.0 }
 0x196   :  { %v543_v55 = vmul.f32 %v1982_v54, %v1982_v54 }
 0x197   :  { %v528_v23 = vsub.f32 %v1940_v10, %v517_v52  ;;  %v529_v56 = vsub.f32 %v1942_v11, %v518_v53 }
 0x198   :  { %v507_v57 = vpop.xlane.xlu1 %506  ;;  %v509_v58 = vpop.xlane.xlu0 %508  ;;  %551 = vadd.xlane.f32.xlu0 %v543_v55 }
 0x199   :  { %v519_v60 = vmul.f32 0.013888889, %v507_v57  ;;  %v520_v59 = vmul.f32 0.013888889, %v509_v58  ;;  %v1990_v61 = vsel %vm526_vm3, %v529_v56, 0.0  ;;  %v1994_v62 = vsel %vm526_vm3, %v528_v23, 0.0 }
 0x19a   :  { %v545_v63 = vmul.f32 %v1990_v61, %v1990_v61  ;;  %v544_v0 = vmul.f32 %v1994_v62, %v1994_v62 }
 0x19b   :  { %v530_v1 = vsub.f32 %v1954_v25, %v519_v60  ;;  %v531_v2 = vsub.f32 %v1956_v26, %v520_v59 }
 0x19c   :  { %v511_v3 = vpop.xlane.xlu1 %510  ;;  %555 = vadd.xlane.f32.xlu0 %v545_v63  ;;  %v513_v4 = vpop.xlane.xlu0 %512  ;;  %553 = vadd.xlane.f32.xlu1 %v544_v0 }
 0x19d   :  { %v521_v5 = vmul.f32 0.013888889, %v511_v3  ;;  %v522_v6 = vmul.f32 0.013888889, %v513_v4  ;;  %v2004_v7 = vsel %vm526_vm3, %v531_v2, 0.0  ;;  %v2008_v8 = vsel %vm526_vm3, %v530_v1, 0.0 }
 0x19e   :  { %v547_v9 = vmul.f32 %v2004_v7, %v2004_v7  ;;  %v546_v10 = vmul.f32 %v2008_v8, %v2008_v8 }
 0x19f   :  { %v532_v11 = vsub.f32 %v1966_v34, %v521_v5  ;;  %v533_v12 = vsub.f32 %v1968_v35, %v522_v6  ;;  %v621_v34 = vld [vmem:[#allocation2 + $0x30] sm:$0xff]  ;;  %v636_v35 = vld [vmem:[#allocation2 + $0xa8] sm:$0xff] }
 0x1a0   :  { %559 = vadd.xlane.f32.xlu0 %v547_v9  ;;  %557 = vadd.xlane.f32.xlu1 %v546_v10  ;;  %v515_v13 = vpop.xlane.xlu1 %514 }
 0x1a1   :  { %v523_v14 = vmul.f32 0.013888889, %v515_v13  ;;  %v2018_v15 = vsel %vm526_vm3, %v533_v12, 0.0  ;;  %v2022_v16 = vsel %vm526_vm3, %v532_v11, 0.0  ;;  %1384 = vmatpush3.msra.mxu1 %v621_v34 }
 0x1a2   :  { %v549_v18 = vmul.f32 %v2018_v15, %v2018_v15  ;;  %v548_v19 = vmul.f32 %v2022_v16, %v2022_v16  ;;  %1385 = vmatprep.subr.mxu1 %v636_v35 }
 0x1a3   :  { %v534_v21 = vsub.f32 %v1972_v37, %v523_v14  ;;  %1386 = vmatpush3.msra.mxu1 %v620_v36  ;;  %v635_v37 = vld [vmem:[#allocation2 + $0xa0] sm:$0xff] }
 0x1a4   :  { %563 = vadd.xlane.f32.xlu0 %v549_v18  ;;  %561 = vadd.xlane.f32.xlu1 %v548_v19 }
 0x1a5   :  { %v2031_v25 = vsel %vm526_vm3, %v534_v21, 0.0  ;;  %1387 = vmatprep.subr.mxu1 %v635_v37 }
 0x1a6   :  { %v550_v26 = vmul.f32 %v2031_v25, %v2031_v25  ;;  %1388 = vmatpush3.msra.mxu1 %v619_v27 }
 0x1a7   :  { %1389 = vmatprep.subr.mxu1 %v634_v38 }
 0x1a8   :  { %565 = vadd.xlane.f32.xlu1 %v550_v26  ;;  %1390 = vmatpush3.msra.mxu1 %v618_v39 }
 0x1a9   :  { %1391 = vmatprep.subr.mxu1 %v633_v40 }
 0x1aa   :  { %1392 = vmatpush3.msra.mxu1 %v617_v41 }
 0x1ab   :  { %1393 = vmatprep.subr.mxu1 %v632_v42  ;;  %v1329_v42 = vld [vmem:[%s2231_s4] ss:$0 sm:$0xff] }
 0x1ac   :  { %1394 = vmatpush3.msra.mxu1 %v616_v43 }
 0x1ad   :  { %1395 = vmatprep.subr.mxu1 %v631_v44 }
 0x1ae   :  { %1396 = vmatpush3.msra.mxu1 %v615_v45 }
 0x221   :  { %v552_v47 = vpop.xlane.xlu0 %551 }
 0x222   :  { %v567_v48 = vmax.f32 %v552_v47, 1e-24 }
 0x224   :  { %1625 = vrsqrt.f32 %v567_v48 }
 0x225   :  { %v556_v49 = vpop.xlane.xlu0 %555  ;;  %v554_v50 = vpop.xlane.xlu1 %553 }
 0x226   :  { %v569_v51 = vmax.f32 %v556_v49, 1e-24  ;;  %v568_v52 = vmax.f32 %v554_v50, 1e-24 }
 0x228   :  { %1627 = vrsqrt.f32 %v569_v51 }
 0x229   :  { %1629 = vrsqrt.f32 %v568_v52  ;;  %v560_v53 = vpop.xlane.xlu0 %559  ;;  %v558_v55 = vpop.xlane.xlu1 %557 }
 0x22a   :  { %v571_v23 = vmax.f32 %v560_v53, 1e-24  ;;  %v570_v56 = vmax.f32 %v558_v55, 1e-24 }
 0x22c   :  { %1631 = vrsqrt.f32 %v571_v23 }
 0x22d   :  { %1633 = vrsqrt.f32 %v570_v56  ;;  %v562_v57 = vpop.xlane.xlu1 %561  ;;  %v564_v58 = vpop.xlane.xlu0 %563 }
 0x22e   :  { %v572_v60 = vmax.f32 %v562_v57, 1e-24  ;;  %v573_v63 = vmax.f32 %v564_v58, 1e-24 }
 0x230   :  { %1635 = vrsqrt.f32 %v572_v60 }
 0x231   :  { %v1626_v59 = vpop.eup %1625  ;;  %v566_v0 = vpop.xlane.xlu1 %565  ;;  %1637 = vrsqrt.f32 %v573_v63 }
 0x232   :  { %v583_v1 = vmul.f32 %v1626_v59, %v1982_v54  ;;  %v574_v4 = vmax.f32 %v566_v0, 1e-24 }
 0x234   :  { %v599_v2 = vsub.f32 0.0, %v583_v1  ;;  %v591_v10 = vmax.f32 %v583_v1, 0.0  ;;  %1639 = vrsqrt.f32 %v574_v4 }
 0x235   :  { %v1628_v3 = vpop.eup %1627 }
 0x236   :  { %v1630_v5 = vpop.eup %1629  ;;  %v607_v6 = vmax.f32 %v599_v2, 0.0  ;;  %v585_v9 = vmul.f32 %v1628_v3, %v1990_v61 }
 0x237   :  { %v584_v11 = vmul.f32 %v1630_v5, %v1994_v62 }
 0x238   :  { %718 = vmatprep.mubr.f32.mxu1 %v607_v6  ;;  %v601_v14 = vsub.f32 0.0, %v585_v9  ;;  %v593_v62 = vmax.f32 %v585_v9, 0.0 }
 0x239   :  { %v1632_v12 = vpop.eup %1631  ;;  %719 = vmatmul.mubr.f32.vlgmr.msra.gmra.mxu1 %v591_v10  ;;  %v600_v13 = vsub.f32 0.0, %v584_v11  ;;  %v592_v19 = vmax.f32 %v584_v11, 0.0 }
 0x23a   :  { %v1634_v17 = vpop.eup %1633  ;;  %v609_v20 = vmax.f32 %v601_v14, 0.0  ;;  %v587_v22 = vmul.f32 %v1632_v12, %v2004_v7  ;;  %v887_v14 = vld [vmem:[#allocation5 + $0x78] sm:$0xff] }
 0x23b   :  { %v608_v18 = vmax.f32 %v600_v13, 0.0  ;;  %v586_v54 = vmul.f32 %v1634_v17, %v2008_v8  ;;  %v903_v13 = vld [vmem:[#allocation5 + $0xf8] sm:$0xff]  ;;  %v902_v17 = vld [vmem:[#allocation5 + $0xf0] sm:$0xff] }
 0x23c   :  { %v603_v26 = vsub.f32 0.0, %v587_v22  ;;  %v595_v7 = vmax.f32 %v587_v22, 0.0  ;;  %1421 = vmatprep.subr.mxu0 %v903_v13  ;;  %v899_v22 = vld [vmem:[#allocation5 + $0xd8] sm:$0xff] }
 0x23d   :  { %723 = vmatprep.mubr.f32.mxu1 %v608_v18  ;;  %v602_v21 = vsub.f32 0.0, %v586_v54  ;;  %v1636_v61 = vpop.eup %1635  ;;  %v594_v31 = vmax.f32 %v586_v54, 0.0  ;;  %v886_v18 = vld [vmem:[#allocation5 + $0x70] sm:$0xff]  ;;  %1422 = vmatpush3.msra.mxu0 %v887_v14  ;;  %v901_v54 = vld [vmem:[#allocation5 + $0xe8] sm:$0xff]  ;;  %v891_v13 = vld [vmem:[#allocation5 + $0x98] sm:$0xff] }
 0x23e   :  { %724 = vmatmul.mubr.f32.gmra.mxu1 %v592_v19  ;;  %v588_v28 = vmul.f32 %v1636_v61, %v2022_v16  ;;  %v1638_v29 = vpop.eup %1637  ;;  %v611_v32 = vmax.f32 %v603_v26, 0.0  ;;  %1423 = vmatprep.subr.mxu0 %v902_v17  ;;  %v885_v19 = vld [vmem:[#allocation5 + $0x68] sm:$0xff]  ;;  %v875_v17 = vld [vmem:[#allocation5 + $0x18] sm:$0xff] }
 0x23f   :  { %728 = vmatprep.mubr.f32.mxu1 %v609_v20  ;;  %v610_v24 = vmax.f32 %v602_v21, 0.0  ;;  %v589_v30 = vmul.f32 %v1638_v29, %v2018_v15  ;;  %1424 = vmatpush3.msra.mxu0 %v886_v18  ;;  %v900_v20 = vld [vmem:[#allocation5 + $0xe0] sm:$0xff] }
 0x240   :  { %v604_v8 = vsub.f32 0.0, %v588_v28  ;;  %v596_v37 = vmax.f32 %v588_v28, 0.0  ;;  %1425 = vmatprep.subr.mxu0 %v901_v54  ;;  %v884_v21 = vld [vmem:[#allocation5 + $0x60] sm:$0xff]  ;;  %v890_v54 = vld [vmem:[#allocation5 + $0x90] sm:$0xff] }
 0x241   :  { %v1640_v33 = vpop.eup %1639  ;;  %v605_v35 = vsub.f32 0.0, %v589_v30  ;;  %v597_v38 = vmax.f32 %v589_v30, 0.0  ;;  %1426 = vmatpush3.msra.mxu0 %v885_v19  ;;  %v874_v19 = vld [vmem:[#allocation5 + $0x10] sm:$0xff] }
 0x242   :  { %729 = vmatmul.mubr.f32.gmra.mxu1 %v593_v62  ;;  %v612_v34 = vmax.f32 %v604_v8, 0.0  ;;  %v590_v36 = vmul.f32 %v1640_v33, %v2031_v25  ;;  %1427 = vmatprep.subr.mxu0 %v900_v20  ;;  %v873_v20 = vld [vmem:[#allocation5 + $0x8] sm:$0xff] }
 0x243   :  { %733 = vmatprep.mubr.f32.mxu1 %v610_v24  ;;  %v613_v16 = vmax.f32 %v605_v35, 0.0  ;;  %1428 = vmatpush3.msra.mxu0 %v884_v21  ;;  %v888_v21 = vld [vmem:[#allocation5 + $0x80] sm:$0xff] }
 0x244   :  { %v606_v27 = vsub.f32 0.0, %v590_v36  ;;  %v598_v15 = vmax.f32 %v590_v36, 0.0  ;;  %1429 = vmatprep.subr.mxu0 %v899_v22  ;;  %v872_v22 = vld [vmem:[#allocation5] sm:$0xff] }
 0x246   :  { %734 = vmatmul.mubr.f32.gmra.mxu1 %v594_v31  ;;  %v614_v39 = vmax.f32 %v606_v27, 0.0 }
 0x247   :  { %738 = vmatprep.mubr.f32.mxu1 %v611_v32 }
 0x24a   :  { %739 = vmatmul.mubr.f32.gmra.mxu1 %v595_v7 }
 0x24b   :  { %743 = vmatprep.mubr.f32.mxu1 %v612_v34 }
 0x24e   :  { %744 = vmatmul.mubr.f32.gmra.mxu1 %v596_v37 }
 0x24f   :  { %748 = vmatprep.mubr.f32.mxu1 %v613_v16 }
 0x252   :  { %749 = vmatmul.mubr.f32.gmra.mxu1 %v597_v38 }
 0x253   :  { %753 = vmatprep.mubr.f32.mxu1 %v614_v39 }
 0x256   :  { %754 = vmatmul.mubr.f32.gmra.mxu1 %v598_v15 }
 0x2f9   :  { %v1397_v40 = vpop.f32.mrf.mxu1 }
 0x2fb   :  { %v1398_v41 = vpop.f32.mrf.mxu1 }
 0x2fc   :  { %v1399_v25 = vadd.f32 %v1398_v41, %v1397_v40  ;;  %v883_v40 = vld [vmem:[#allocation5 + $0x58] sm:$0xff] }
 0x2fd   :  { %1430 = vmatpush3.msra.mxu0 %v883_v40 }
 0x2fe   :  { %v1400_v43 = vpop.f32.mrf.mxu1  ;;  %v721_v44 = vadd.f32 %v1399_v25, %v1329_v42 }
 0x300   :  { %v1401_v45 = vpop.f32.mrf.mxu1  ;;  %759 = vadd.xlane.f32.xlu0 %v721_v44 }
 0x301   :  { %v1402_v47 = vadd.f32 %v1401_v45, %v1400_v43  ;;  %v882_v43 = vld [vmem:[#allocation5 + $0x50] sm:$0xff] }
 0x302   :  { %v1403_v48 = vpop.f32.mrf.mxu1 }
 0x303   :  { %v726_v49 = vadd.f32 %v1402_v47, %v1329_v42 }
 0x304   :  { %v1404_v50 = vpop.f32.mrf.mxu1 }
 0x305   :  { %v1405_v51 = vadd.f32 %v1404_v50, %v1403_v48  ;;  %761 = vadd.xlane.f32.xlu1 %v726_v49 }
 0x306   :  { %v1406_v52 = vpop.f32.mrf.mxu1 }
 0x307   :  { %v2046_v53 = vadd.f32 %v1405_v51, %v1329_v42  ;;  %v896_v51 = vld [vmem:[#allocation5 + $0xc0] sm:$0xff] }
 0x308   :  { %v1407_v55 = vpop.f32.mrf.mxu1 }
 0x309   :  { %v1408_v23 = vadd.f32 %v1407_v55, %v1406_v52  ;;  %763 = vadd.xlane.f32.xlu0 %v2046_v53 }
 0x30a   :  { %v1409_v56 = vpop.f32.mrf.mxu1 }
 0x30b   :  { %v2049_v57 = vadd.f32 %v1408_v23, %v1329_v42  ;;  %v895_v23 = vld [vmem:[#allocation5 + $0xb8] sm:$0xff] }
 0x30c   :  { %v1410_v58 = vpop.f32.mrf.mxu1 }
 0x30d   :  { %v1411_v60 = vadd.f32 %v1410_v58, %v1409_v56  ;;  %765 = vadd.xlane.f32.xlu1 %v2049_v57  ;;  %v879_v58 = vld [vmem:[#allocation5 + $0x38] sm:$0xff] }
 0x30e   :  { %v1412_v59 = vpop.f32.mrf.mxu1 }
 0x30f   :  { %v2052_v63 = vadd.f32 %v1411_v60, %v1329_v42 }
 0x310   :  { %v1413_v0 = vpop.f32.mrf.mxu1 }
 0x311   :  { %v1414_v1 = vadd.f32 %v1413_v0, %v1412_v59  ;;  %767 = vadd.xlane.f32.xlu0 %v2052_v63  ;;  %v894_v59 = vld [vmem:[#allocation5 + $0xb0] sm:$0xff] }
 0x312   :  { %v1415_v2 = vpop.f32.mrf.mxu1  ;;  %v878_v0 = vld [vmem:[#allocation5 + $0x30] sm:$0xff] }
 0x313   :  { %v2055_v3 = vadd.f32 %v1414_v1, %v1329_v42 }
 0x314   :  { %v1416_v4 = vpop.f32.mrf.mxu1 }
 0x315   :  { %v1417_v5 = vadd.f32 %v1416_v4, %v1415_v2  ;;  %769 = vadd.xlane.f32.xlu1 %v2055_v3  ;;  %v893_v2 = vld [vmem:[#allocation5 + $0xa8] sm:$0xff] }
 0x316   :  { %v1418_v6 = vpop.f32.mrf.mxu1 }
 0x317   :  { %v2058_v9 = vadd.f32 %v1417_v5, %v1329_v42  ;;  %v877_v5 = vld [vmem:[#allocation5 + $0x28] sm:$0xff] }
 0x318   :  { %v1419_v10 = vpop.f32.mrf.mxu1 }
 0x319   :  { %v1420_v11 = vadd.f32 %v1419_v10, %v1418_v6  ;;  %771 = vadd.xlane.f32.xlu0 %v2058_v9  ;;  %v892_v10 = vld [vmem:[#allocation5 + $0xa0] sm:$0xff] }
 0x31b   :  { %v2061_v12 = vadd.f32 %v1420_v11, %v1329_v42  ;;  %v898_v42 = vld [vmem:[#allocation5 + $0xd0] sm:$0xff]  ;;  %v876_v11 = vld [vmem:[#allocation5 + $0x20] sm:$0xff] }
 0x31c   :  { %1431 = vmatprep.subr.mxu0 %v898_v42 }
 0x31d   :  { %773 = vadd.xlane.f32.xlu1 %v2061_v12  ;;  %1432 = vmatpush3.msra.mxu0 %v882_v43 }
 0x389   :  { %v760_v61 = vpop.xlane.xlu0 %759 }
 0x38a   :  { %v775_v62 = vmul.f32 0.083333336, %v760_v61 }
 0x38c   :  { %v784_v24 = vsub.f32 %v721_v44, %v775_v62  ;;  %v897_v44 = vld [vmem:[#allocation5 + $0xc8] sm:$0xff] }
 0x38d   :  { %1433 = vmatprep.subr.mxu0 %v897_v44 }
 0x38e   :  { %v762_v26 = vpop.xlane.xlu1 %761  ;;  %v2067_v28 = vsel %vm783_vm4, %v784_v24, 0.0 }
 0x38f   :  { %v776_v29 = vmul.f32 0.083333336, %v762_v26  ;;  %v800_v31 = vmul.f32 %v2067_v28, %v2067_v28 }
 0x391   :  { %v785_v32 = vsub.f32 %v726_v49, %v776_v29  ;;  %808 = vadd.xlane.f32.xlu0 %v800_v31  ;;  %v881_v49 = vld [vmem:[#allocation5 + $0x48] sm:$0xff] }
 0x392   :  { %v764_v8 = vpop.xlane.xlu0 %763  ;;  %1434 = vmatpush3.msra.mxu0 %v881_v49 }
 0x393   :  { %v777_v30 = vmul.f32 0.083333336, %v764_v8  ;;  %v2073_v33 = vsel %vm783_vm4, %v785_v32, 0.0  ;;  %1435 = vmatprep.subr.mxu0 %v896_v51 }
 0x394   :  { %v801_v7 = vmul.f32 %v2073_v33, %v2073_v33 }
 0x395   :  { %v786_v34 = vsub.f32 %v2046_v53, %v777_v30  ;;  %v880_v53 = vld [vmem:[#allocation5 + $0x40] sm:$0xff] }
 0x396   :  { %810 = vadd.xlane.f32.xlu1 %v801_v7  ;;  %v766_v35 = vpop.xlane.xlu1 %765  ;;  %1436 = vmatpush3.msra.mxu0 %v880_v53 }
 0x397   :  { %v778_v36 = vmul.f32 0.083333336, %v766_v35  ;;  %v2080_v37 = vsel %vm783_vm4, %v786_v34, 0.0  ;;  %1437 = vmatprep.subr.mxu0 %v895_v23 }
 0x398   :  { %v802_v16 = vmul.f32 %v2080_v37, %v2080_v37  ;;  %1438 = vmatpush3.msra.mxu0 %v879_v58 }
 0x399   :  { %v787_v27 = vsub.f32 %v2049_v57, %v778_v36  ;;  %1439 = vmatprep.subr.mxu0 %v894_v59 }
 0x39a   :  { %v768_v38 = vpop.xlane.xlu0 %767  ;;  %812 = vadd.xlane.f32.xlu0 %v802_v16  ;;  %1440 = vmatpush3.msra.mxu0 %v878_v0 }
 0x39b   :  { %v779_v39 = vmul.f32 0.083333336, %v768_v38  ;;  %v2087_v15 = vsel %vm783_vm4, %v787_v27, 0.0  ;;  %1441 = vmatprep.subr.mxu0 %v893_v2 }
 0x39c   :  { %v803_v41 = vmul.f32 %v2087_v15, %v2087_v15  ;;  %1442 = vmatpush3.msra.mxu0 %v877_v5 }
 0x39d   :  { %v788_v25 = vsub.f32 %v2052_v63, %v779_v39  ;;  %1443 = vmatprep.subr.mxu0 %v892_v10 }
 0x39e   :  { %814 = vadd.xlane.f32.xlu1 %v803_v41  ;;  %v770_v45 = vpop.xlane.xlu1 %769  ;;  %1444 = vmatpush3.msra.mxu0 %v876_v11 }
 0x39f   :  { %v780_v47 = vmul.f32 0.083333336, %v770_v45  ;;  %v2094_v48 = vsel %vm783_vm4, %v788_v25, 0.0  ;;  %1445 = vmatprep.subr.mxu0 %v891_v13 }
 0x3a0   :  { %v804_v50 = vmul.f32 %v2094_v48, %v2094_v48  ;;  %1446 = vmatpush3.msra.mxu0 %v875_v17 }
 0x3a1   :  { %v789_v52 = vsub.f32 %v2055_v3, %v780_v47  ;;  %1447 = vmatprep.subr.mxu0 %v890_v54 }
 0x3a2   :  { %816 = vadd.xlane.f32.xlu0 %v804_v50  ;;  %v772_v55 = vpop.xlane.xlu0 %771  ;;  %1448 = vmatpush3.msra.mxu0 %v874_v19 }
 0x3a3   :  { %v781_v56 = vmul.f32 0.083333336, %v772_v55  ;;  %v2101_v57 = vsel %vm783_vm4, %v789_v52, 0.0 }
 0x3a4   :  { %v805_v60 = vmul.f32 %v2101_v57, %v2101_v57 }
 0x3a5   :  { %v790_v63 = vsub.f32 %v2058_v9, %v781_v56 }
 0x3a6   :  { %818 = vadd.xlane.f32.xlu1 %v805_v60  ;;  %v774_v1 = vpop.xlane.xlu1 %773 }
 0x3a7   :  { %v782_v3 = vmul.f32 0.083333336, %v774_v1  ;;  %v2108_v4 = vsel %vm783_vm4, %v790_v63, 0.0 }
 0x3a8   :  { %v806_v6 = vmul.f32 %v2108_v4, %v2108_v4 }
 0x3a9   :  { %v791_v9 = vsub.f32 %v2061_v12, %v782_v3  ;;  %v889_v12 = vld [vmem:[#allocation5 + $0x88] sm:$0xff] }
 0x3aa   :  { %820 = vadd.xlane.f32.xlu0 %v806_v6  ;;  %1449 = vmatprep.subr.mxu0 %v889_v12 }
 0x3ab   :  { %v2115_v14 = vsel %vm783_vm4, %v791_v9, 0.0  ;;  %1450 = vmatpush3.msra.mxu0 %v873_v20 }
 0x3ac   :  { %v807_v18 = vmul.f32 %v2115_v14, %v2115_v14  ;;  %1451 = vmatprep.subr.mxu0 %v888_v21 }
 0x3ad   :  { %1452 = vmatpush3.msra.mxu0 %v872_v22 }
 0x3ae   :  { %822 = vadd.xlane.f32.xlu1 %v807_v18 }
 0x41a   :  { %v809_v61 = vpop.xlane.xlu0 %808 }
 0x41b   :  { %v824_v62 = vmax.f32 %v809_v61, 1e-24 }
 0x41d   :  { %1641 = vrsqrt.f32 %v824_v62 }
 0x41f   :  { %v811_v24 = vpop.xlane.xlu1 %810 }
 0x420   :  { %v825_v26 = vmax.f32 %v811_v24, 1e-24 }
 0x422   :  { %1643 = vrsqrt.f32 %v825_v26 }
 0x423   :  { %v813_v29 = vpop.xlane.xlu0 %812 }
 0x424   :  { %v826_v31 = vmax.f32 %v813_v29, 1e-24 }
 0x426   :  { %1645 = vrsqrt.f32 %v826_v31 }
 0x427   :  { %v815_v32 = vpop.xlane.xlu1 %814 }
 0x428   :  { %v827_v8 = vmax.f32 %v815_v32, 1e-24 }
 0x42a   :  { %v1642_v30 = vpop.eup %1641  ;;  %1647 = vrsqrt.f32 %v827_v8 }
 0x42b   :  { %v817_v7 = vpop.xlane.xlu0 %816  ;;  %v840_v34 = vmul.f32 %v1642_v30, %v2067_v28 }
 0x42c   :  { %v828_v35 = vmax.f32 %v817_v7, 1e-24 }
 0x42d   :  { %v856_v36 = vsub.f32 0.0, %v840_v34  ;;  %v848_v40 = vmax.f32 %v840_v34, 0.0 }
 0x42e   :  { %1649 = vrsqrt.f32 %v828_v35 }
 0x42f   :  { %v1644_v16 = vpop.eup %1643  ;;  %v819_v27 = vpop.xlane.xlu1 %818  ;;  %v864_v38 = vmax.f32 %v856_v36, 0.0 }
 0x430   :  { %v829_v39 = vmax.f32 %v819_v27, 1e-24  ;;  %v841_v41 = vmul.f32 %v1644_v16, %v2073_v33 }
 0x431   :  { %975 = vmatprep.mubr.f32.mxu0 %v864_v38 }
 0x432   :  { %1651 = vrsqrt.f32 %v829_v39  ;;  %976 = vmatmul.mubr.f32.vlgmr.msra.gmra.mxu0 %v848_v40  ;;  %v857_v42 = vsub.f32 0.0, %v841_v41  ;;  %v849_v47 = vmax.f32 %v841_v41, 0.0 }
 0x433   :  { %v1646_v25 = vpop.eup %1645  ;;  %v821_v43 = vpop.xlane.xlu0 %820 }
 0x434   :  { %v830_v44 = vmax.f32 %v821_v43, 1e-24  ;;  %v865_v45 = vmax.f32 %v857_v42, 0.0  ;;  %v842_v28 = vmul.f32 %v1646_v25, %v2080_v37 }
 0x436   :  { %1653 = vrsqrt.f32 %v830_v44  ;;  %980 = vmatprep.mubr.f32.mxu0 %v865_v45  ;;  %v858_v49 = vsub.f32 0.0, %v842_v28  ;;  %v850_v55 = vmax.f32 %v842_v28, 0.0 }
 0x437   :  { %v1648_v50 = vpop.eup %1647  ;;  %981 = vmatmul.mubr.f32.gmra.mxu0 %v849_v47  ;;  %v823_v51 = vpop.xlane.xlu1 %822 }
 0x438   :  { %v831_v52 = vmax.f32 %v823_v51, 1e-24  ;;  %v866_v53 = vmax.f32 %v858_v49, 0.0  ;;  %v843_v33 = vmul.f32 %v1648_v50, %v2087_v15  ;;  %v1159_v49 = vld [vmem:[#allocation7 + $0xf8] sm:$0xff]  ;;  %v1158_v51 = vld [vmem:[#allocation7 + $0xf0] sm:$0xff] }
 0x439   :  { %v1143_v50 = vld [vmem:[#allocation7 + $0x78] sm:$0xff]  ;;  %1587 = vmatprep.subr.mxu1 %v1159_v49  ;;  %1477 = vmatprep.subr.mxu0 %v1159_v49 }
 0x43a   :  { %1655 = vrsqrt.f32 %v831_v52  ;;  %985 = vmatprep.mubr.f32.mxu0 %v866_v53  ;;  %v859_v23 = vsub.f32 0.0, %v843_v33  ;;  %v851_v60 = vmax.f32 %v843_v33, 0.0  ;;  %v1142_v52 = vld [vmem:[#allocation7 + $0x70] sm:$0xff]  ;;  %1603 = vmatpush3.msra.mxu1 %v1143_v50  ;;  %v1157_v53 = vld [vmem:[#allocation7 + $0xe8] sm:$0xff]  ;;  %v1147_v49 = vld [vmem:[#allocation7 + $0x98] sm:$0xff] }
 0x43b   :  { %v1650_v56 = vpop.eup %1649  ;;  %986 = vmatmul.mubr.f32.gmra.mxu0 %v850_v55  ;;  %1588 = vmatprep.subr.mxu1 %v1158_v51  ;;  %v1141_v33 = vld [vmem:[#allocation7 + $0x68] sm:$0xff]  ;;  %v1156_v55 = vld [vmem:[#allocation7 + $0xe0] sm:$0xff] }
 0x43c   :  { %v867_v58 = vmax.f32 %v859_v23, 0.0  ;;  %v844_v37 = vmul.f32 %v1650_v56, %v2094_v48  ;;  %1478 = vmatpush3.msra.mxu0 %v1143_v50  ;;  %1604 = vmatpush3.msra.mxu1 %v1142_v52  ;;  %v1140_v23 = vld [vmem:[#allocation7 + $0x60] sm:$0xff]  ;;  %v1155_v56 = vld [vmem:[#allocation7 + $0xd8] sm:$0xff] }
 0x43d   :  { %1479 = vmatprep.subr.mxu0 %v1158_v51  ;;  %1589 = vmatprep.subr.mxu1 %v1157_v53  ;;  %v1131_v50 = vld [vmem:[#allocation7 + $0x18] sm:$0xff]  ;;  %v1146_v51 = vld [vmem:[#allocation7 + $0x90] sm:$0xff] }
 0x43e   :  { %990 = vmatprep.mubr.f32.mxu0 %v867_v58  ;;  %v860_v59 = vsub.f32 0.0, %v844_v37  ;;  %v852_v2 = vmax.f32 %v844_v37, 0.0  ;;  %1480 = vmatpush3.msra.mxu0 %v1142_v52  ;;  %v1130_v52 = vld [vmem:[#allocation7 + $0x10] sm:$0xff] }
 0x43f   :  { %v1652_v63 = vpop.eup %1651  ;;  %991 = vmatmul.mubr.f32.gmra.mxu0 %v851_v60  ;;  %1481 = vmatprep.subr.mxu0 %v1157_v53  ;;  %v1145_v53 = vld [vmem:[#allocation7 + $0x88] sm:$0xff] }
 0x440   :  { %v868_v0 = vmax.f32 %v860_v59, 0.0  ;;  %v845_v1 = vmul.f32 %v1652_v63, %v2101_v57  ;;  %1605 = vmatpush3.msra.mxu1 %v1141_v33  ;;  %1482 = vmatpush3.msra.mxu0 %v1141_v33  ;;  %v1129_v33 = vld [vmem:[#allocation7 + $0x8] sm:$0xff] }
 0x441   :  { %1590 = vmatprep.subr.mxu1 %v1156_v55  ;;  %1483 = vmatprep.subr.mxu0 %v1156_v55  ;;  %v1144_v55 = vld [vmem:[#allocation7 + $0x80] sm:$0xff] }
 0x442   :  { %995 = vmatprep.mubr.f32.mxu0 %v868_v0  ;;  %v861_v15 = vsub.f32 0.0, %v845_v1  ;;  %v853_v10 = vmax.f32 %v845_v1, 0.0  ;;  %1606 = vmatpush3.msra.mxu1 %v1140_v23 }
 0x443   :  { %v1654_v3 = vpop.eup %1653  ;;  %996 = vmatmul.mubr.f32.gmra.mxu0 %v852_v2  ;;  %1591 = vmatprep.subr.mxu1 %v1155_v56 }
 0x444   :  { %v869_v5 = vmax.f32 %v861_v15, 0.0  ;;  %v846_v6 = vmul.f32 %v1654_v3, %v2108_v4  ;;  %1484 = vmatpush3.msra.mxu0 %v1140_v23  ;;  %v1128_v23 = vld [vmem:[#allocation7] sm:$0xff] }
 0x445   :  { %1485 = vmatprep.subr.mxu0 %v1155_v56 }
 0x446   :  { %1000 = vmatprep.mubr.f32.mxu0 %v869_v5  ;;  %v862_v9 = vsub.f32 0.0, %v846_v6  ;;  %v854_v17 = vmax.f32 %v846_v6, 0.0 }
 0x447   :  { %v1656_v48 = vpop.eup %1655  ;;  %1001 = vmatmul.mubr.f32.gmra.mxu0 %v853_v10 }
 0x448   :  { %v870_v11 = vmax.f32 %v862_v9, 0.0  ;;  %v847_v13 = vmul.f32 %v1656_v48, %v2115_v14  ;;  %v1330_v14 = vld [vmem:[%s2233_s6] ss:$0 sm:$0xff] }
 0x44a   :  { %1005 = vmatprep.mubr.f32.mxu0 %v870_v11  ;;  %v863_v18 = vsub.f32 0.0, %v847_v13  ;;  %v855_v54 = vmax.f32 %v847_v13, 0.0 }
 0x44b   :  { %1006 = vmatmul.mubr.f32.gmra.mxu0 %v854_v17 }
 0x44c   :  { %v871_v57 = vmax.f32 %v863_v18, 0.0 }
 0x44e   :  { %1010 = vmatprep.mubr.f32.mxu0 %v871_v57 }
 0x44f   :  { %1011 = vmatmul.mubr.f32.gmra.mxu0 %v855_v54 }
 0x4f2   :  { %v1453_v19 = vpop.f32.mrf.mxu0 }
 0x4f4   :  { %v1454_v12 = vpop.f32.mrf.mxu0 }
 0x4f5   :  { %v1455_v34 = vadd.f32 %v1454_v12, %v1453_v19 }
 0x4f7   :  { %v1456_v20 = vpop.f32.mrf.mxu0  ;;  %v2139_v39 = vadd.f32 %v1455_v34, %v1330_v14 }
 0x4f9   :  { %v1457_v4 = vpop.f32.mrf.mxu0 }
 0x4fa   :  { %v1458_v38 = vadd.f32 %v1457_v4, %v1456_v20 }
 0x4fb   :  { %v1459_v21 = vpop.f32.mrf.mxu0 }
 0x4fc   :  { %v2145_v43 = vadd.f32 %v1458_v38, %v1330_v14  ;;  %v1152_v38 = vld [vmem:[#allocation7 + $0xc0] sm:$0xff] }
 0x4fd   :  { %v1460_v22 = vpop.f32.mrf.mxu0 }
 0x4fe   :  { %v1461_v61 = vadd.f32 %v1460_v22, %v1459_v21 }
 0x4ff   :  { %v1462_v62 = vpop.f32.mrf.mxu0 }
 0x500   :  { %v2130_v24 = vadd.f32 %v1461_v61, %v1330_v14 }
 0x501   :  { %v1463_v26 = vpop.f32.mrf.mxu0 }
 0x502   :  { %v1464_v29 = vadd.f32 %v1463_v26, %v1462_v62  ;;  %1020 = vadd.xlane.f32.xlu0 %v2130_v24 }
 0x503   :  { %v1465_v31 = vpop.f32.mrf.mxu0 }
 0x504   :  { %v2133_v32 = vadd.f32 %v1464_v29, %v1330_v14 }
 0x505   :  { %v1466_v8 = vpop.f32.mrf.mxu0 }
 0x506   :  { %v1467_v30 = vadd.f32 %v1466_v8, %v1465_v31  ;;  %1022 = vadd.xlane.f32.xlu1 %v2133_v32  ;;  %v1138_v31 = vld [vmem:[#allocation7 + $0x50] sm:$0xff]  ;;  %v1153_v8 = vld [vmem:[#allocation7 + $0xc8] sm:$0xff] }
 0x507   :  { %v1468_v7 = vpop.f32.mrf.mxu0 }
 0x508   :  { %v2136_v35 = vadd.f32 %v1467_v30, %v1330_v14 }
 0x509   :  { %v1469_v36 = vpop.f32.mrf.mxu0 }
 0x50a   :  { %v1470_v16 = vadd.f32 %v1469_v36, %v1468_v7  ;;  %1024 = vadd.xlane.f32.xlu0 %v2136_v35 }
 0x50b   :  { %v1471_v27 = vpop.f32.mrf.mxu0 }
 0x50c   :  { %v2141_v40 = vadd.f32 %v1470_v16, %v1330_v14  ;;  %v1137_v16 = vld [vmem:[#allocation7 + $0x48] sm:$0xff] }
 0x50d   :  { %v1472_v41 = vpop.f32.mrf.mxu0 }
 0x50e   :  { %v1473_v42 = vadd.f32 %v1472_v41, %v1471_v27  ;;  %1016 = vadd.xlane.f32.xlu0 %v2139_v39  ;;  %1026 = vadd.xlane.f32.xlu1 %v2141_v40  ;;  %v1151_v41 = vld [vmem:[#allocation7 + $0xb8] sm:$0xff] }
 0x50f   :  { %v1474_v25 = vpop.f32.mrf.mxu0 }
 0x510   :  { %v2147_v44 = vadd.f32 %v1473_v42, %v1330_v14 }
 0x511   :  { %v1475_v45 = vpop.f32.mrf.mxu0 }
 0x512   :  { %v1476_v28 = vadd.f32 %v1475_v45, %v1474_v25  ;;  %1018 = vadd.xlane.f32.xlu0 %v2145_v43  ;;  %1028 = vadd.xlane.f32.xlu1 %v2147_v44  ;;  %v1135_v25 = vld [vmem:[#allocation7 + $0x38] sm:$0xff]  ;;  %v1149_v45 = vld [vmem:[#allocation7 + $0xa8] sm:$0xff] }
 0x514   :  { %v2151_v47 = vadd.f32 %v1476_v28, %v1330_v14  ;;  %v1139_v14 = vld [vmem:[#allocation7 + $0x58] sm:$0xff]  ;;  %v1148_v28 = vld [vmem:[#allocation7 + $0xa0] sm:$0xff] }
 0x515   :  { %1607 = vmatpush3.msra.mxu1 %v1139_v14  ;;  %1486 = vmatpush3.msra.mxu0 %v1139_v14 }
 0x516   :  { %1030 = vadd.xlane.f32.xlu1 %v2151_v47 }
 0x58b   :  { %v1021_v58 = vpop.xlane.xlu0 %1020 }
 0x58c   :  { %v1034_v37 = vmul.f32 0.083333336, %v1021_v58 }
 0x58e   :  { %v1042_v60 = vsub.f32 %v2130_v24, %v1034_v37  ;;  %v1154_v24 = vld [vmem:[#allocation7 + $0xd0] sm:$0xff] }
 0x58f   :  { %v1023_v59 = vpop.xlane.xlu1 %1022  ;;  %1592 = vmatprep.subr.mxu1 %v1154_v24  ;;  %1487 = vmatprep.subr.mxu0 %v1154_v24 }
 0x590   :  { %v1035_v63 = vmul.f32 0.083333336, %v1023_v59  ;;  %v2157_v0 = vsel %vm783_vm4, %v1042_v60, 0.0  ;;  %1608 = vmatpush3.msra.mxu1 %v1138_v31  ;;  %1488 = vmatpush3.msra.mxu0 %v1138_v31 }
 0x591   :  { %v1058_v1 = vmul.f32 %v2157_v0, %v2157_v0  ;;  %1593 = vmatprep.subr.mxu1 %v1153_v8  ;;  %1489 = vmatprep.subr.mxu0 %v1153_v8 }
 0x592   :  { %v1043_v2 = vsub.f32 %v2133_v32, %v1035_v63  ;;  %1609 = vmatpush3.msra.mxu1 %v1137_v16  ;;  %1490 = vmatpush3.msra.mxu0 %v1137_v16 }
 0x593   :  { %1068 = vadd.xlane.f32.xlu0 %v1058_v1  ;;  %v1025_v15 = vpop.xlane.xlu0 %1024  ;;  %1594 = vmatprep.subr.mxu1 %v1152_v38 }
 0x594   :  { %v1036_v3 = vmul.f32 0.083333336, %v1025_v15  ;;  %v2164_v5 = vsel %vm783_vm4, %v1043_v2, 0.0  ;;  %1491 = vmatprep.subr.mxu0 %v1152_v38 }
 0x595   :  { %v1059_v6 = vmul.f32 %v2164_v5, %v2164_v5 }
 0x596   :  { %v1044_v10 = vsub.f32 %v2136_v35, %v1036_v3 }
 0x597   :  { %v1017_v9 = vpop.xlane.xlu0 %1016  ;;  %1070 = vadd.xlane.f32.xlu1 %v1059_v6  ;;  %v1027_v48 = vpop.xlane.xlu1 %1026 }
 0x598   :  { %v1032_v11 = vmul.f32 0.083333336, %v1017_v9  ;;  %v1037_v13 = vmul.f32 0.083333336, %v1027_v48  ;;  %v2171_v17 = vsel %vm783_vm4, %v1044_v10, 0.0 }
 0x599   :  { %v1060_v18 = vmul.f32 %v2171_v17, %v2171_v17 }
 0x59a   :  { %v1040_v57 = vsub.f32 %v2139_v39, %v1032_v11  ;;  %v1045_v54 = vsub.f32 %v2141_v40, %v1037_v13  ;;  %v1136_v39 = vld [vmem:[#allocation7 + $0x40] sm:$0xff] }
 0x59b   :  { %1072 = vadd.xlane.f32.xlu0 %v1060_v18  ;;  %v1019_v19 = vpop.xlane.xlu0 %1018  ;;  %v1029_v12 = vpop.xlane.xlu1 %1028  ;;  %1610 = vmatpush3.msra.mxu1 %v1136_v39 }
 0x59c   :  { %v1033_v20 = vmul.f32 0.083333336, %v1019_v19  ;;  %v1038_v4 = vmul.f32 0.083333336, %v1029_v12  ;;  %v2179_v21 = vsel %vm783_vm4, %v1040_v57, 0.0  ;;  %v2183_v22 = vsel %vm783_vm4, %v1045_v54, 0.0  ;;  %1492 = vmatpush3.msra.mxu0 %v1136_v39  ;;  %1595 = vmatprep.subr.mxu1 %v1151_v41 }
 0x59d   :  { %v1056_v61 = vmul.f32 %v2179_v21, %v2179_v21  ;;  %v1061_v62 = vmul.f32 %v2183_v22, %v2183_v22  ;;  %1611 = vmatpush3.msra.mxu1 %v1135_v25  ;;  %1493 = vmatprep.subr.mxu0 %v1151_v41 }
 0x59e   :  { %v1041_v26 = vsub.f32 %v2145_v43, %v1033_v20  ;;  %v1046_v29 = vsub.f32 %v2147_v44, %v1038_v4  ;;  %v1150_v43 = vld [vmem:[#allocation7 + $0xb0] sm:$0xff]  ;;  %1494 = vmatpush3.msra.mxu0 %v1135_v25 }
 0x59f   :  { %1064 = vadd.xlane.f32.xlu0 %v1056_v61  ;;  %1074 = vadd.xlane.f32.xlu1 %v1061_v62  ;;  %v1031_v32 = vpop.xlane.xlu1 %1030  ;;  %v1134_v44 = vld [vmem:[#allocation7 + $0x30] sm:$0xff] }
 0x5a0   :  { %v1039_v30 = vmul.f32 0.083333336, %v1031_v32  ;;  %v2193_v7 = vsel %vm783_vm4, %v1041_v26, 0.0  ;;  %v2197_v34 = vsel %vm783_vm4, %v1046_v29, 0.0  ;;  %1596 = vmatprep.subr.mxu1 %v1150_v43  ;;  %1495 = vmatprep.subr.mxu0 %v1150_v43 }
 0x5a1   :  { %v1057_v35 = vmul.f32 %v2193_v7, %v2193_v7  ;;  %v1062_v36 = vmul.f32 %v2197_v34, %v2197_v34  ;;  %1612 = vmatpush3.msra.mxu1 %v1134_v44  ;;  %1496 = vmatpush3.msra.mxu0 %v1134_v44 }
 0x5a2   :  { %v1047_v27 = vsub.f32 %v2151_v47, %v1039_v30  ;;  %1597 = vmatprep.subr.mxu1 %v1149_v45  ;;  %v1132_v47 = vld [vmem:[#allocation7 + $0x20] sm:$0xff]  ;;  %1497 = vmatprep.subr.mxu0 %v1149_v45 }
 0x5a3   :  { %1066 = vadd.xlane.f32.xlu0 %v1057_v35  ;;  %1076 = vadd.xlane.f32.xlu1 %v1062_v36 }
 0x5a4   :  { %v2206_v40 = vsel %vm783_vm4, %v1047_v27, 0.0  ;;  %1613 = vmatpush3.msra.mxu1 %v1133_v46  ;;  %1498 = vmatpush3.msra.mxu0 %v1133_v46 }
 0x5a5   :  { %v1063_v42 = vmul.f32 %v2206_v40, %v2206_v40  ;;  %1598 = vmatprep.subr.mxu1 %v1148_v28  ;;  %1499 = vmatprep.subr.mxu0 %v1148_v28 }
 0x5a6   :  { %1614 = vmatpush3.msra.mxu1 %v1132_v47  ;;  %1500 = vmatpush3.msra.mxu0 %v1132_v47 }
 0x5a7   :  { %1078 = vadd.xlane.f32.xlu1 %v1063_v42  ;;  %1599 = vmatprep.subr.mxu1 %v1147_v49 }
 0x5a8   :  { %1615 = vmatpush3.msra.mxu1 %v1131_v50  ;;  %1501 = vmatprep.subr.mxu0 %v1147_v49 }
 0x5a9   :  { %1600 = vmatprep.subr.mxu1 %v1146_v51  ;;  %1502 = vmatpush3.msra.mxu0 %v1131_v50 }
 0x5aa   :  { %1616 = vmatpush3.msra.mxu1 %v1130_v52  ;;  %1503 = vmatprep.subr.mxu0 %v1146_v51  ;;  %v1331_v51 = vld [vmem:[%s2235_s8] ss:$0 sm:$0xff]  ;;  %s1764_s8 = smov [#allocation8]  }
 0x5ab   :  { %1601 = vmatprep.subr.mxu1 %v1145_v53  ;;  %1504 = vmatpush3.msra.mxu0 %v1130_v52  ;;  %s1285_s19 = sshll.u32 %s1764_s8, 4  ;;  %s1286_s19 = int_to_ptr.vmem [resolvable:$true] %s1285_s19 }
 0x5ac   :  { %1617 = vmatpush3.msra.mxu1 %v1129_v33  ;;  %1505 = vmatprep.subr.mxu0 %v1145_v53  ;;  %s1733_s20 = scalar_lea.vmem %s1286_s19, 1024  ;;  %p1738_p2 = scmp.lt.s32.totalorder %s1286_s19, %s1286_s19 }
 0x5ad   :  { %1602 = vmatprep.subr.mxu1 %v1144_v55  ;;  %1506 = vmatpush3.msra.mxu0 %v1129_v33  ;;  %p1734_p1 = scmp.ne.s32.totalorder %s1286_s19, %s1733_s20  ;;  %p1739_p3 = scmp.lt.s32.totalorder %s1733_s20, %s1733_s20 }
 0x5ae   :  { %1618 = vmatpush3.msra.mxu1 %v1128_v23  ;;  %1507 = vmatprep.subr.mxu0 %v1144_v55 }
 0x5af   :  { %1508 = vmatpush3.msra.mxu0 %v1128_v23  ;;  %p1740_p4 = por %p1739_p3, %p1738_p2 }
 0x5b1   :  { %p1741_p5 = pnand %p1740_p4, %p1734_p1 }
 0x61c   :  { %v1069_v56 = vpop.xlane.xlu0 %1068 }
 0x61d   :  { %v1082_v58 = vmax.f32 %v1069_v56, 1e-24 }
 0x61f   :  { %1657 = vrsqrt.f32 %v1082_v58 }
 0x620   :  { %v1071_v37 = vpop.xlane.xlu1 %1070 }
 0x621   :  { %v1083_v60 = vmax.f32 %v1071_v37, 1e-24 }
 0x623   :  { %1659 = vrsqrt.f32 %v1083_v60 }
 0x624   :  { %v1073_v59 = vpop.xlane.xlu0 %1072 }
 0x625   :  { %v1084_v63 = vmax.f32 %v1073_v59, 1e-24 }
 0x627   :  { %1661 = vrsqrt.f32 %v1084_v63 }
 0x628   :  { %v1065_v1 = vpop.xlane.xlu0 %1064  ;;  %v1075_v2 = vpop.xlane.xlu1 %1074 }
 0x629   :  { %v1080_v15 = vmax.f32 %v1065_v1, 1e-24  ;;  %v1085_v3 = vmax.f32 %v1075_v2, 1e-24 }
 0x62b   :  { %1663 = vrsqrt.f32 %v1080_v15 }
 0x62c   :  { %v1658_v6 = vpop.eup %1657  ;;  %1665 = vrsqrt.f32 %v1085_v3  ;;  %v1067_v10 = vpop.xlane.xlu0 %1066 }
 0x62d   :  { %v1077_v9 = vpop.xlane.xlu1 %1076  ;;  %v1081_v48 = vmax.f32 %v1067_v10, 1e-24  ;;  %v1098_v13 = vmul.f32 %v1658_v6, %v2157_v0 }
 0x62e   :  { %v1086_v11 = vmax.f32 %v1077_v9, 1e-24 }
 0x62f   :  { %1667 = vrsqrt.f32 %v1081_v48  ;;  %v1114_v18 = vsub.f32 0.0, %v1098_v13  ;;  %v1106_v4 = vmax.f32 %v1098_v13, 0.0 }
 0x630   :  { %v1660_v57 = vpop.eup %1659  ;;  %1669 = vrsqrt.f32 %v1086_v11 }
 0x631   :  { %v1079_v54 = vpop.xlane.xlu1 %1078  ;;  %v1122_v12 = vmax.f32 %v1114_v18, 0.0  ;;  %v1099_v20 = vmul.f32 %v1660_v57, %v2164_v5 }
 0x632   :  { %v1087_v19 = vmax.f32 %v1079_v54, 1e-24 }
 0x633   :  { %1241 = vmatprep.mubr.f32.mxu1 %v1122_v12  ;;  %v1115_v61 = vsub.f32 0.0, %v1099_v20  ;;  %v1107_v26 = vmax.f32 %v1099_v20, 0.0 }
 0x634   :  { %1671 = vrsqrt.f32 %v1087_v19  ;;  %v1662_v62 = vpop.eup %1661  ;;  %1242 = vmatmul.mubr.f32.vlgmr.msra.gmra.mxu1 %v1106_v4 }
 0x635   :  { %v1123_v14 = vmax.f32 %v1115_v61, 0.0  ;;  %v1100_v24 = vmul.f32 %v1662_v62, %v2171_v17 }
 0x637   :  { %1246 = vmatprep.mubr.f32.mxu1 %v1123_v14  ;;  %v1116_v0 = vsub.f32 0.0, %v1100_v24  ;;  %v1108_v30 = vmax.f32 %v1100_v24, 0.0 }
 0x638   :  { %v1664_v29 = vpop.eup %1663  ;;  %1247 = vmatmul.mubr.f32.gmra.mxu1 %v1107_v26 }
 0x639   :  { %v1666_v31 = vpop.eup %1665  ;;  %v1124_v32 = vmax.f32 %v1116_v0, 0.0  ;;  %v1096_v8 = vmul.f32 %v1664_v29, %v2179_v21 }
 0x63a   :  { %v1101_v5 = vmul.f32 %v1666_v31, %v2183_v22 }
 0x63b   :  { %1251 = vmatprep.mubr.f32.mxu1 %v1124_v32  ;;  %v1112_v35 = vsub.f32 0.0, %v1096_v8  ;;  %v1104_v39 = vmax.f32 %v1096_v8, 0.0 }
 0x63c   :  { %v1668_v36 = vpop.eup %1667  ;;  %1252 = vmatmul.mubr.f32.gmra.mxu1 %v1108_v30  ;;  %v1117_v16 = vsub.f32 0.0, %v1101_v5  ;;  %v1109_v25 = vmax.f32 %v1101_v5, 0.0 }
 0x63d   :  { %v1670_v27 = vpop.eup %1669  ;;  %v1120_v38 = vmax.f32 %v1112_v35, 0.0  ;;  %v1097_v17 = vmul.f32 %v1668_v36, %v2193_v7 }
 0x63e   :  { %v1125_v41 = vmax.f32 %v1117_v16, 0.0  ;;  %v1102_v42 = vmul.f32 %v1670_v27, %v2197_v34 }
 0x63f   :  { %1231 = vmatprep.mubr.f32.mxu0 %v1120_v38  ;;  %v1113_v43 = vsub.f32 0.0, %v1097_v17  ;;  %v1105_v28 = vmax.f32 %v1097_v17, 0.0 }
 0x640   :  { %1256 = vmatprep.mubr.f32.mxu1 %v1125_v41  ;;  %1232 = vmatmul.mubr.f32.vlgmr.msra.gmra.mxu0 %v1104_v39  ;;  %v1118_v22 = vsub.f32 0.0, %v1102_v42  ;;  %v1110_v47 = vmax.f32 %v1102_v42, 0.0 }
 0x641   :  { %v1672_v21 = vpop.eup %1671  ;;  %1257 = vmatmul.mubr.f32.gmra.mxu1 %v1109_v25  ;;  %v1121_v44 = vmax.f32 %v1113_v43, 0.0 }
 0x642   :  { %v1103_v45 = vmul.f32 %v1672_v21, %v2206_v40  ;;  %v1126_v46 = vmax.f32 %v1118_v22, 0.0 }
 0x643   :  { %1236 = vmatprep.mubr.f32.mxu0 %v1121_v44 }
 0x644   :  { %v1119_v7 = vsub.f32 0.0, %v1103_v45  ;;  %1261 = vmatprep.mubr.f32.mxu1 %v1126_v46  ;;  %1237 = vmatmul.mubr.f32.gmra.mxu0 %v1105_v28  ;;  %v1111_v49 = vmax.f32 %v1103_v45, 0.0 }
 0x645   :  { %1262 = vmatmul.mubr.f32.gmra.mxu1 %v1110_v47 }
 0x646   :  { %v1127_v34 = vmax.f32 %v1119_v7, 0.0 }
 0x648   :  { %1266 = vmatprep.mubr.f32.mxu1 %v1127_v34 }
 0x649   :  { %1267 = vmatmul.mubr.f32.gmra.mxu1 %v1111_v49 }
 0x6f4   :  { %v1515_v50 = vpop.f32.mrf.mxu1 }
 0x6f6   :  { %v1516_v52 = vpop.f32.mrf.mxu1 }
 0x6f7   :  { %v1517_v53 = vadd.f32 %v1516_v52, %v1515_v50 }
 0x6f8   :  { %v1518_v40 = vpop.f32.mrf.mxu1 }
 0x6f9   :  { %v1244_v33 = vadd.f32 %v1517_v53, %v1331_v51 }
 0x6fa   :  { %v1519_v55 = vpop.f32.mrf.mxu1 }
 0x6fb   :  { %1274 = vst [vmem:[#allocation8 + $0x10] sm:$0xff] %v1244_v33  ;;  %v1520_v23 = vadd.f32 %v1519_v55, %v1518_v40 }
 0x6fc   :  { %v1521_v56 = vpop.f32.mrf.mxu1 }
 0x6fd   :  { %v1249_v58 = vadd.f32 %v1520_v23, %v1331_v51 }
 0x6fe   :  { %v1522_v37 = vpop.f32.mrf.mxu1 }
 0x6ff   :  { %1275 = vst [vmem:[#allocation8 + $0x18] sm:$0xff] %v1249_v58  ;;  %v1523_v60 = vadd.f32 %v1522_v37, %v1521_v56 }
 0x700   :  { %v1509_v59 = vpop.f32.mrf.mxu0 }
 0x701   :  { %v1254_v63 = vadd.f32 %v1523_v60, %v1331_v51  ;;  %v1524_v1 = vpop.f32.mrf.mxu1 }
 0x702   :  { %v1510_v2 = vpop.f32.mrf.mxu0 }
 0x703   :  { %1276 = vst [vmem:[#allocation8 + $0x20] sm:$0xff] %v1254_v63  ;;  %v1511_v15 = vadd.f32 %v1510_v2, %v1509_v59  ;;  %v1525_v3 = vpop.f32.mrf.mxu1 }
 0x704   :  { %v1526_v6 = vadd.f32 %v1525_v3, %v1524_v1  ;;  %v1512_v10 = vpop.f32.mrf.mxu0 }
 0x705   :  { %v1234_v9 = vadd.f32 %v1511_v15, %v1331_v51  ;;  %v1527_v48 = vpop.f32.mrf.mxu1 }
 0x706   :  { %v1259_v11 = vadd.f32 %v1526_v6, %v1331_v51  ;;  %v1513_v13 = vpop.f32.mrf.mxu0 }
 0x707   :  { %1272 = vst [vmem:[#allocation8] sm:$0xff] %v1234_v9  ;;  %v1514_v18 = vadd.f32 %v1513_v13, %v1512_v10  ;;  %v1528_v57 = vpop.f32.mrf.mxu1 }
 0x708   :  { %1277 = vst [vmem:[#allocation8 + $0x28] sm:$0xff] %v1259_v11  ;;  %v1529_v54 = vadd.f32 %v1528_v57, %v1527_v48 }
 0x709   :  { %v1239_v19 = vadd.f32 %v1514_v18, %v1331_v51  ;;  %v1530_v12 = vpop.f32.mrf.mxu1 }
 0x70a   :  { %v1264_v20 = vadd.f32 %v1529_v54, %v1331_v51 }
 0x70b   :  { %1273 = vst [vmem:[#allocation8 + $0x8] sm:$0xff] %v1239_v19  ;;  %v1531_v4 = vpop.f32.mrf.mxu1 }
 0x70c   :  { %1278 = vst [vmem:[#allocation8 + $0x30] sm:$0xff] %v1264_v20  ;;  %v1532_v61 = vadd.f32 %v1531_v4, %v1530_v12 }
 0x70e   :  { %v1269_v62 = vadd.f32 %v1532_v61, %v1331_v51 }
 0x710   :  { %1279 = vst [vmem:[#allocation8 + $0x38] sm:$0xff] %v1269_v62 }
 0x711   :  { %1744 = shalt.err (!%p1741_p5)
}
 0x712   :  { %1291 = dma.vmem_to_hbm [thread:$0]  %s1286_s19, 1024, %s2236_s9, [#allocation4], %s1761_s14, %s1761_s14, %s1762_s15  }
 0x713   :  { %1757 = dma.done.wait [#allocation4], 1024  }
 0x714   :  { %1758 = vsyncadd [#allocation4], 4294966272 }
 0x715   :  { %1295 = vsyncpa [#allocation3], 1 }
 0x716   :  { %1296 = vsyncpa [#allocation6], 1 }
 0x717   :  { %1297 = vsyncpa [#allocation4], 1 }

</bundles_post_ra>
